<compile_context>
chip_gen: v6e
topology: v6e:2x2x1
jax: 0.10.0
libtpu: 0.0.40
codegen_flags: <defaults>
</compile_context>

<pallas_src>
import functools
import math
from math import ceil

import jax
import jax.numpy as jnp
from jax import lax
from jax.experimental import pallas as pl
from jax.experimental.pallas import tpu as pltpu


def _round_up(a, b):
    return (a + b - 1) // b * b


def _pick_seq_block(n_pad, target):
    """Largest multiple-of-8 divisor of n_pad <= target (else whole sequence)."""
    target = min(n_pad, max(8, target))
    for d in range(target, 7, -1):
        if n_pad % d == 0 and d % 8 == 0:
            return d
    return n_pad


# ---------------------------------------------------------------------------
# Kernel 1: to_qkv projection — one wide matmul per row block
# ---------------------------------------------------------------------------

def _qkv_proj_kernel(x_ref, w_ref, o_ref, *, heads, dim_head):
    x = x_ref[...].astype(jnp.bfloat16)
    w = w_ref[...].astype(jnp.bfloat16)
    mm = jnp.dot(x, w, preferred_element_type=jnp.float32)      # (bq, 3*heads*d)
    for p in range(3):
        for h in range(heads):
            j = p * heads + h
            o_ref[p, h] = mm[:, j * dim_head:(j + 1) * dim_head].astype(o_ref.dtype)


def _qkv_projection(x2d, w_qkv, heads, dim_head, block_rows):
    rows, dim = x2d.shape
    three_hd = 3 * heads * dim_head
    w_mat = jnp.transpose(w_qkv)             # (dim, 3*heads*d), cols ordered (proj, head, d)
    bq = min(_round_up(block_rows, 8), _round_up(rows, 8))
    kern = functools.partial(_qkv_proj_kernel, heads=heads, dim_head=dim_head)
    return pl.pallas_call(
        kern,
        out_shape=jax.ShapeDtypeStruct((3, heads, rows, dim_head), jnp.bfloat16),
        grid=(pl.cdiv(rows, bq),),
        in_specs=[pl.BlockSpec((bq, dim), lambda i: (i, 0)),
                  pl.BlockSpec((dim, three_hd), lambda i: (0, 0))],
        out_specs=pl.BlockSpec((3, heads, bq, dim_head), lambda i: (0, 0, i, 0)),
        compiler_params=pltpu.CompilerParams(dimension_semantics=("parallel",)),
    )(x2d, w_mat)


# ---------------------------------------------------------------------------
# Kernel 2: landmarks (segmented sublane sum) + attn2  (f32, pinv path)
# ---------------------------------------------------------------------------

def _landmark_kernel(qg_ref, kg_ref, qlm_ref, klm_ref, a2_ref, *, scale, l):
    inv_l = 1.0 / l
    qg = qg_ref[...].astype(jnp.float32)              # (nlm, l, d)
    kg = kg_ref[...].astype(jnp.float32)
    q_lm = jnp.sum(qg, axis=1) * (scale * inv_l)      # scale folded (ref scales q pre-pool)
    k_lm = jnp.sum(kg, axis=1) * inv_l
    qlm_ref[0] = q_lm
    klm_ref[0] = k_lm
    sim2 = lax.dot_general(q_lm, k_lm, (((1,), (1,)), ((), ())),
                           preferred_element_type=jnp.float32)
    sim2 = sim2 - jnp.max(sim2, axis=-1, keepdims=True)
    e2 = jnp.exp(sim2)
    a2_ref[0] = e2 / jnp.sum(e2, axis=-1, keepdims=True)   # exact division (pinv path)


def _landmark_stage(q_hb, k_hb, *, scale, l, nlm):
    hb, n_pad, d = q_hb.shape
    q_grp = q_hb.reshape(hb * nlm, l, d)              # free reshapes of contiguous data
    k_grp = k_hb.reshape(hb * nlm, l, d)
    kern = functools.partial(_landmark_kernel, scale=scale, l=l)
    grp_spec = pl.BlockSpec((nlm, l, d), lambda i: (i, 0, 0))
    lm_spec = pl.BlockSpec((1, nlm, d), lambda i: (i, 0, 0))
    return pl.pallas_call(
        kern,
        out_shape=(jax.ShapeDtypeStruct((hb, nlm, d), jnp.float32),
                   jax.ShapeDtypeStruct((hb, nlm, d), jnp.float32),
                   jax.ShapeDtypeStruct((hb, nlm, nlm), jnp.float32)),
        grid=(hb,),
        in_specs=[grp_spec, grp_spec],
        out_specs=(lm_spec, lm_spec,
                   pl.BlockSpec((1, nlm, nlm), lambda i: (i, 0, 0))),
        compiler_params=pltpu.CompilerParams(dimension_semantics=("parallel",)),
    )(q_grp, k_grp)


# ---------------------------------------------------------------------------
# Kernel 3: Moore-Penrose iterative pinv (hoisted, per head*batch, f32)
# ---------------------------------------------------------------------------

def _pinv_kernel(inv_ref, a2_ref, z_ref, *, iters):
    f32 = jnp.float32
    a2 = a2_ref[0]
    nlm = a2.shape[-1]
    ii = lax.broadcasted_iota(jnp.int32, (nlm, nlm), 0)
    jj = lax.broadcasted_iota(jnp.int32, (nlm, nlm), 1)
    eye = (ii == jj).astype(f32)
    z = jnp.transpose(a2) * inv_ref[0, 0]             # global 1/(max(col)*max(row))
    for _ in range(iters):                            # static unroll
        xz = jnp.dot(a2, z, preferred_element_type=f32)
        t = 7.0 * eye - xz
        t = 15.0 * eye - jnp.dot(xz, t, preferred_element_type=f32)
        t = 13.0 * eye - jnp.dot(xz, t, preferred_element_type=f32)
        z = 0.25 * jnp.dot(z, t, preferred_element_type=f32)
    z_ref[0] = z


def _pinv_stage(attn2, inv_norm, *, iters):
    hb, nlm, _ = attn2.shape
    kern = functools.partial(_pinv_kernel, iters=iters)
    a2_spec = pl.BlockSpec((1, nlm, nlm), lambda i: (i, 0, 0))
    return pl.pallas_call(
        kern,
        out_shape=jax.ShapeDtypeStruct((hb, nlm, nlm), jnp.float32),
        grid=(hb,),
        in_specs=[pl.BlockSpec(memory_space=pltpu.MemorySpace.SMEM), a2_spec],
        out_specs=a2_spec,
        compiler_params=pltpu.CompilerParams(dimension_semantics=("parallel",)),
    )(inv_norm, attn2)


# ---------------------------------------------------------------------------
# Kernel 4: kv stage — online softmax over N for attn3, finalize zw = z @ (attn3 @ v)
# ---------------------------------------------------------------------------

def _kv_stage_kernel(qlm_ref, z_ref, k_ref, v_ref, zw_ref, m_s, s_s, w3_s):
    j = pl.program_id(1)

    @pl.when(j == 0)
    def _():
        m_s[...] = jnp.full(m_s.shape, -jnp.inf, m_s.dtype)
        s_s[...] = jnp.zeros(s_s.shape, s_s.dtype)
        w3_s[...] = jnp.zeros(w3_s.shape, w3_s.dtype)

    q_lm = qlm_ref[0].astype(jnp.bfloat16)            # (L, D), scale already folded
    sim3 = lax.dot_general(q_lm, k_ref[0], (((1,), (1,)), ((), ())),
                           preferred_element_type=jnp.float32)    # (L, bn)
    m_new = jnp.maximum(m_s[...], jnp.max(sim3, axis=-1, keepdims=True))
    corr = jnp.exp(m_s[...] - m_new)
    p = jnp.exp(sim3 - m_new)
    s_s[...] = s_s[...] * corr + jnp.sum(p, axis=-1, keepdims=True)
    w3_s[...] = w3_s[...] * corr + jnp.dot(p.astype(jnp.bfloat16), v_ref[0],
                                           preferred_element_type=jnp.float32)
    m_s[...] = m_new

    @pl.when(j == pl.num_programs(1) - 1)
    def _():
        w3 = w3_s[...] / s_s[...]                     # deferred softmax norm on (L, D)
        zw_ref[0] = jnp.dot(z_ref[0], w3, preferred_element_type=jnp.float32)


def _kv_stage(k_hb, v_hb, q_lm, z, *, block_n):
    hb, n_pad, d = k_hb.shape
    nlm = q_lm.shape[1]
    bn = _pick_seq_block(n_pad, block_n)              # must divide n_pad (softmax over rows)
    lm_spec = pl.BlockSpec((1, nlm, d), lambda i, j: (i, 0, 0))
    seq_spec = pl.BlockSpec((1, bn, d), lambda i, j: (i, j, 0))
    return pl.pallas_call(
        _kv_stage_kernel,
        out_shape=jax.ShapeDtypeStruct((hb, nlm, d), jnp.float32),
        grid=(hb, n_pad // bn),
        in_specs=[lm_spec,
                  pl.BlockSpec((1, nlm, nlm), lambda i, j: (i, 0, 0)),
                  seq_spec, seq_spec],
        out_specs=lm_spec,
        scratch_shapes=[pltpu.VMEM((nlm, 1), jnp.float32),
                        pltpu.VMEM((nlm, 1), jnp.float32),
                        pltpu.VMEM((nlm, d), jnp.float32)],
        compiler_params=pltpu.CompilerParams(
            dimension_semantics=("parallel", "arbitrary")),
    )(q_lm, z, k_hb, v_hb)


# ---------------------------------------------------------------------------
# Kernel 5: q stage — attn1 @ zw + residual, N-tiled, fully parallel
# ---------------------------------------------------------------------------

def _q_stage_kernel(res_ref, klm_ref, zw_ref, q_ref, v_ref, o_ref, *, scale):
    k_lm_s = (klm_ref[0] * scale).astype(jnp.bfloat16)     # fold scale into (L, D)
    sim1 = lax.dot_general(q_ref[0], k_lm_s, (((1,), (1,)), ((), ())),
                           preferred_element_type=jnp.float32)    # (bn, L)
    sim1 = sim1 - jnp.max(sim1, axis=-1, keepdims=True)
    e1 = jnp.exp(sim1)
    s1 = jnp.sum(e1, axis=-1, keepdims=True)
    num = jnp.dot(e1.astype(jnp.bfloat16), zw_ref[0].astype(jnp.bfloat16),
                  preferred_element_type=jnp.float32)             # (bn, D)
    out = num * pl.reciprocal(s1, approx=True)                    # normalize on (bn, D)
    # residual: Conv2d(heads, heads, 1, groups=heads) == per-head scalar * v
    out = out + v_ref[0].astype(jnp.float32) * res_ref[pl.program_id(0)]
    o_ref[0] = out.astype(o_ref.dtype)


def _q_stage(q_hb, v_hb, k_lm, zw, res_w, *, scale, block_n):
    hb, n_pad, d = q_hb.shape
    nlm = k_lm.shape[1]
    bn = _pick_seq_block(n_pad, block_n)
    kern = functools.partial(_q_stage_kernel, scale=scale)
    lm_spec = pl.BlockSpec((1, nlm, d), lambda i, j: (i, 0, 0))
    seq_spec = pl.BlockSpec((1, bn, d), lambda i, j: (i, j, 0))
    return pl.pallas_call(
        kern,
        out_shape=jax.ShapeDtypeStruct((hb, n_pad, d), jnp.bfloat16),
        grid=(hb, n_pad // bn),
        in_specs=[pl.BlockSpec(memory_space=pltpu.MemorySpace.SMEM),
                  lm_spec, lm_spec, seq_spec, seq_spec],
        out_specs=seq_spec,
        compiler_params=pltpu.CompilerParams(
            dimension_semantics=("parallel", "parallel")),
    )(res_w, k_lm, zw, q_hb, v_hb)


# ---------------------------------------------------------------------------
# Kernel 6: to_out projection (head reduction inside a single grid step)
# ---------------------------------------------------------------------------

def _out_proj_kernel(xh_ref, w_ref, b_ref, o_ref):
    heads = xh_ref.shape[0]
    w = w_ref[...].astype(jnp.bfloat16)               # (heads, d, dim)
    acc = jnp.zeros(o_ref.shape, jnp.float32)
    for h in range(heads):                            # static unroll over heads
        acc = acc + jnp.dot(xh_ref[h], w[h], preferred_element_type=jnp.float32)
    o_ref[...] = (acc + b_ref[...]).astype(o_ref.dtype)


def _out_projection(xh, w_out, b_out, block_rows):
    heads, rows, d = xh.shape
    dim = w_out.shape[0]
    # (dim, heads*d) -> per-head (d, dim) weights (tiny constant reshape)
    w_h = jnp.transpose(w_out.reshape(dim, heads, d), (1, 2, 0))
    bq = min(_round_up(block_rows, 8), _round_up(rows, 8))
    return pl.pallas_call(
        _out_proj_kernel,
        out_shape=jax.ShapeDtypeStruct((rows, dim), jnp.float32),
        grid=(pl.cdiv(rows, bq),),
        in_specs=[pl.BlockSpec((heads, bq, d), lambda i: (0, i, 0)),
                  pl.BlockSpec((heads, d, dim), lambda i: (0, 0, 0)),
                  pl.BlockSpec((1, dim), lambda i: (0, 0))],
        out_specs=pl.BlockSpec((bq, dim), lambda i: (i, 0)),
        compiler_params=pltpu.CompilerParams(dimension_semantics=("parallel",)),
    )(xh, w_h, b_out.reshape(1, dim))


# ---------------------------------------------------------------------------
# Forward wrapper
# ---------------------------------------------------------------------------

def nystrom_attention_forward(x, params, *, heads, dim_head, m, pinv_iterations,
                              block_n=1024, block_rows=1024):
    b, n, dim = x.shape
    scale = dim_head ** -0.5

    remainder = n % m
    if remainder > 0:
        x = jnp.pad(x, ((0, 0), (0, m - remainder), (0, 0)))   # spec pads at the END
    n_pad = x.shape[1]
    l = ceil(n / m)
    nlm = n_pad // l          # == m
    rows = b * n_pad
    hb = heads * b

    # --- 1) to_qkv projection (bf16 outputs, wide MXU matmul) ---
    qkv = _qkv_projection(x.reshape(rows, dim), params['w_qkv'], heads, dim_head,
                          block_rows)
    q = qkv[0].reshape(hb, n_pad, dim_head)           # free leading-dim reshapes
    k = qkv[1].reshape(hb, n_pad, dim_head)
    v = qkv[2].reshape(hb, n_pad, dim_head)

    # --- 2) landmarks (segmented sum) + attn2 ---
    q_lm, k_lm, attn2 = _landmark_stage(q, k, scale=scale, l=l, nlm=nlm)

    # global Moore-Penrose normalization scalar (tiny XLA reduction; attn2 >= 0)
    inv_norm = 1.0 / (jnp.max(jnp.sum(attn2, axis=-1)) *
                      jnp.max(jnp.sum(attn2, axis=-2)))
    inv_norm = inv_norm.reshape(1, 1).astype(jnp.float32)

    # --- 3) Moore-Penrose pseudo-inverse (hoisted out of the streaming core) ---
    z = _pinv_stage(attn2, inv_norm, iters=pinv_iterations)

    # --- 4) kv stage: zw = z @ softmax(sim3) @ v with online softmax over N ---
    zw = _kv_stage(k, v, q_lm, z, block_n=block_n)

    # --- 5) q stage: softmax(sim1) @ zw + residual ---
    res_w = jnp.repeat(params['res_w'].astype(jnp.float32), b)   # (hb,), head-major
    out_heads = _q_stage(q, v, k_lm, zw, res_w, scale=scale, block_n=block_n)

    # --- 6) to_out projection (no transpose; head reduction in-kernel) ---
    y = _out_projection(out_heads.reshape(heads, rows, dim_head),
                        params['w_out'], params['b_out'], block_rows)
    return y.reshape(b, n_pad, dim)[:, :n]


# ---------------------------------------------------------------------------
# Pure-JAX reference (mirrors the provided PyTorch spec, no mask)
# ---------------------------------------------------------------------------

def nystrom_attention_reference(x, params, *, heads, dim_head, m, pinv_iterations):
    b, n, dim = x.shape
    scale = dim_head ** -0.5
    remainder = n % m
    if remainder > 0:
        x = jnp.pad(x, ((0, 0), (0, m - remainder), (0, 0)))
    n_pad = x.shape[1]
    l = ceil(n / m)
    nlm = n_pad // l

    qkv = x @ params['w_qkv'].T
    q, k, v = jnp.split(qkv, 3, axis=-1)

    def heads_split(t):
        return jnp.transpose(t.reshape(b, n_pad, heads, dim_head), (0, 2, 1, 3))

    q, k, v = map(heads_split, (q, k, v))
    q = q * scale
    q_lm = q.reshape(b, heads, nlm, l, dim_head).sum(3) / l
    k_lm = k.reshape(b, heads, nlm, l, dim_head).sum(3) / l
    sim1 = jnp.einsum('bhid,bhjd->bhij', q, k_lm)
    sim2 = jnp.einsum('bhid,bhjd->bhij', q_lm, k_lm)
    sim3 = jnp.einsum('bhid,bhjd->bhij', q_lm, k)
    attn1, attn2, attn3 = map(lambda s: jax.nn.softmax(s, axis=-1),
                              (sim1, sim2, sim3))
    abs2 = jnp.abs(attn2)
    z = jnp.swapaxes(attn2, -1, -2) / (jnp.max(abs2.sum(-1)) * jnp.max(abs2.sum(-2)))
    eye = jnp.eye(nlm)[None, None]
    for _ in range(pinv_iterations):
        xz = attn2 @ z
        z = 0.25 * z @ (13.0 * eye - xz @ (15.0 * eye - xz @ (7.0 * eye - xz)))
    attn = attn1 @ z @ attn3
    out = jnp.einsum('bhij,bhjd->bhid', attn, v)
    out = out + v * params['res_w'].reshape(1, heads, 1, 1)
    out = jnp.transpose(out, (0, 2, 1, 3)).reshape(b, n_pad, heads * dim_head)
    out = out @ params['w_out'].T + params['b_out']
    return out[:, :n]


# ---------------------------------------------------------------------------
# Main
# ---------------------------------------------------------------------------

if __name__ == "__main__":
    dim, heads, dim_head = 64, 2, 64
    m_landmarks, pinv_iters = 8, 6
    batch, seq = 2, 12                               # seq % m != 0 -> exercises padding

    inner = heads * dim_head
    key = jax.random.PRNGKey(0)
    kx, k1, k2, k3, k4 = jax.random.split(key, 5)
    params = dict(
        w_qkv=jax.random.normal(k1, (inner * 3, dim), jnp.float32) * 0.25,
        w_out=jax.random.normal(k2, (dim, inner), jnp.float32) * 0.05,
        b_out=jax.random.normal(k3, (dim,), jnp.float32) * 0.05,
        res_w=jax.random.normal(k4, (heads,), jnp.float32) * 0.5,
    )
    x = jax.random.normal(kx, (batch, seq, dim), jnp.float32)

    # Small blocks so the multi-block (online-softmax / multi-row-block) paths are
    # exercised even at this tiny test shape.
    fwd = jax.jit(functools.partial(
        nystrom_attention_forward, heads=heads, dim_head=dim_head,
        m=m_landmarks, pinv_iterations=pinv_iters,
        block_n=8, block_rows=16))
    out = jax.block_until_ready(fwd(x, params))

    ref = jax.block_until_ready(nystrom_attention_reference(
        x, params, heads=heads, dim_head=dim_head,
        m=m_landmarks, pinv_iterations=pinv_iters))

    assert out.shape == (batch, seq, dim), out.shape
    max_err = float(jnp.max(jnp.abs(out - ref)))
    tol = 5e-2 * (1.0 + float(jnp.max(jnp.abs(ref))))   # bf16 storage/MXU vs f32 ref
    assert max_err < tol, f"mismatch vs reference: max abs err {max_err} (tol {tol})"
    print("KERNEL_OK")
</pallas_src>

<mosaic_0001>
module attributes {stable_mosaic.version = 11 : i64} {
  func.func @_qkv_proj_kernel(%arg0: i32, %arg1: memref<16x64xf32, #tpu.memory_space<vmem>>, %arg2: memref<64x384xf32, #tpu.memory_space<vmem>>, %arg3: memref<3x2x16x64xbf16, #tpu.memory_space<vmem>>) attributes {dimension_semantics = [#tpu.dimension_semantics<parallel>], iteration_bounds = array<i64: 2>, scalar_prefetch = 0 : i64, scratch_operands = 0 : i64, tpu.core_type = #tpu.core_type<tc>, window_params = [{transform_indices = @transform_0, window_bounds = array<i64: 16, 64>}, {pipeline_mode = #tpu.pipeline_mode<synchronous>, transform_indices = @transform_1, window_bounds = array<i64: 64, 384>}, {transform_indices = @transform_2, window_bounds = array<i64: 3, 2, 16, 64>}]} {
    %c0 = arith.constant 0 : index
    %c0_0 = arith.constant 0 : index
    %0 = vector.load %arg1[%c0, %c0_0] : memref<16x64xf32, #tpu.memory_space<vmem>>, vector<16x64xf32>
    %1 = arith.truncf %0 : vector<16x64xf32> to vector<16x64xbf16>
    %c0_1 = arith.constant 0 : index
    %c0_2 = arith.constant 0 : index
    %2 = vector.load %arg2[%c0_1, %c0_2] : memref<64x384xf32, #tpu.memory_space<vmem>>, vector<64x384xf32>
    %3 = arith.truncf %2 : vector<64x384xf32> to vector<64x384xbf16>
    %cst = arith.constant dense<0.000000e+00> : vector<16x384xf32>
    %4 = tpu.matmul %1, %3, %cst {dimension_numbers = #tpu.dot_dimension_numbers<[1], [0], [0], [1], [0, 0, 1, 1], [], []>} : vector<16x64xbf16>, vector<64x384xbf16>, vector<16x384xf32> -> vector<16x384xf32>
    %5 = vector.extract_strided_slice %4 {offsets = [0, 0], sizes = [16, 64], strides = [1, 1]} : vector<16x384xf32> to vector<16x64xf32>
    %6 = arith.truncf %5 : vector<16x64xf32> to vector<16x64xbf16>
    %c0_3 = arith.constant 0 : index
    %c0_4 = arith.constant 0 : index
    %c0_5 = arith.constant 0 : index
    %c0_6 = arith.constant 0 : index
    %7 = vector.load %arg3[%c0_3, %c0_4, %c0_5, %c0_6] : memref<3x2x16x64xbf16, #tpu.memory_space<vmem>>, vector<1x1x16x64xbf16>
    %8 = vector.shape_cast %7 : vector<1x1x16x64xbf16> to vector<16x64xbf16>
    %9 = vector.shape_cast %6 : vector<16x64xbf16> to vector<1x1x16x64xbf16>
    tpu.vector_store %arg3[%c0_3, %c0_4, %c0_5, %c0_6], %9 {strides = array<i32>} : memref<3x2x16x64xbf16, #tpu.memory_space<vmem>>, vector<1x1x16x64xbf16>,
    %10 = vector.extract_strided_slice %4 {offsets = [0, 64], sizes = [16, 64], strides = [1, 1]} : vector<16x384xf32> to vector<16x64xf32>
    %11 = arith.truncf %10 : vector<16x64xf32> to vector<16x64xbf16>
    %c0_7 = arith.constant 0 : index
    %c1 = arith.constant 1 : index
    %c0_8 = arith.constant 0 : index
    %c0_9 = arith.constant 0 : index
    %12 = vector.load %arg3[%c0_7, %c1, %c0_8, %c0_9] : memref<3x2x16x64xbf16, #tpu.memory_space<vmem>>, vector<1x1x16x64xbf16>
    %13 = vector.shape_cast %12 : vector<1x1x16x64xbf16> to vector<16x64xbf16>
    %14 = vector.shape_cast %11 : vector<16x64xbf16> to vector<1x1x16x64xbf16>
    tpu.vector_store %arg3[%c0_7, %c1, %c0_8, %c0_9], %14 {strides = array<i32>} : memref<3x2x16x64xbf16, #tpu.memory_space<vmem>>, vector<1x1x16x64xbf16>,
    %15 = vector.extract_strided_slice %4 {offsets = [0, 128], sizes = [16, 64], strides = [1, 1]} : vector<16x384xf32> to vector<16x64xf32>
    %16 = arith.truncf %15 : vector<16x64xf32> to vector<16x64xbf16>
    %c1_10 = arith.constant 1 : index
    %c0_11 = arith.constant 0 : index
    %c0_12 = arith.constant 0 : index
    %c0_13 = arith.constant 0 : index
    %17 = vector.load %arg3[%c1_10, %c0_11, %c0_12, %c0_13] : memref<3x2x16x64xbf16, #tpu.memory_space<vmem>>, vector<1x1x16x64xbf16>
    %18 = vector.shape_cast %17 : vector<1x1x16x64xbf16> to vector<16x64xbf16>
    %19 = vector.shape_cast %16 : vector<16x64xbf16> to vector<1x1x16x64xbf16>
    tpu.vector_store %arg3[%c1_10, %c0_11, %c0_12, %c0_13], %19 {strides = array<i32>} : memref<3x2x16x64xbf16, #tpu.memory_space<vmem>>, vector<1x1x16x64xbf16>,
    %20 = vector.extract_strided_slice %4 {offsets = [0, 192], sizes = [16, 64], strides = [1, 1]} : vector<16x384xf32> to vector<16x64xf32>
    %21 = arith.truncf %20 : vector<16x64xf32> to vector<16x64xbf16>
    %c1_14 = arith.constant 1 : index
    %c1_15 = arith.constant 1 : index
    %c0_16 = arith.constant 0 : index
    %c0_17 = arith.constant 0 : index
    %22 = vector.load %arg3[%c1_14, %c1_15, %c0_16, %c0_17] : memref<3x2x16x64xbf16, #tpu.memory_space<vmem>>, vector<1x1x16x64xbf16>
    %23 = vector.shape_cast %22 : vector<1x1x16x64xbf16> to vector<16x64xbf16>
    %24 = vector.shape_cast %21 : vector<16x64xbf16> to vector<1x1x16x64xbf16>
    tpu.vector_store %arg3[%c1_14, %c1_15, %c0_16, %c0_17], %24 {strides = array<i32>} : memref<3x2x16x64xbf16, #tpu.memory_space<vmem>>, vector<1x1x16x64xbf16>,
    %25 = vector.extract_strided_slice %4 {offsets = [0, 256], sizes = [16, 64], strides = [1, 1]} : vector<16x384xf32> to vector<16x64xf32>
    %26 = arith.truncf %25 : vector<16x64xf32> to vector<16x64xbf16>
    %c2 = arith.constant 2 : index
    %c0_18 = arith.constant 0 : index
    %c0_19 = arith.constant 0 : index
    %c0_20 = arith.constant 0 : index
    %27 = vector.load %arg3[%c2, %c0_18, %c0_19, %c0_20] : memref<3x2x16x64xbf16, #tpu.memory_space<vmem>>, vector<1x1x16x64xbf16>
    %28 = vector.shape_cast %27 : vector<1x1x16x64xbf16> to vector<16x64xbf16>
    %29 = vector.shape_cast %26 : vector<16x64xbf16> to vector<1x1x16x64xbf16>
    tpu.vector_store %arg3[%c2, %c0_18, %c0_19, %c0_20], %29 {strides = array<i32>} : memref<3x2x16x64xbf16, #tpu.memory_space<vmem>>, vector<1x1x16x64xbf16>,
    %30 = vector.extract_strided_slice %4 {offsets = [0, 320], sizes = [16, 64], strides = [1, 1]} : vector<16x384xf32> to vector<16x64xf32>
    %31 = arith.truncf %30 : vector<16x64xf32> to vector<16x64xbf16>
    %c2_21 = arith.constant 2 : index
    %c1_22 = arith.constant 1 : index
    %c0_23 = arith.constant 0 : index
    %c0_24 = arith.constant 0 : index
    %32 = vector.load %arg3[%c2_21, %c1_22, %c0_23, %c0_24] : memref<3x2x16x64xbf16, #tpu.memory_space<vmem>>, vector<1x1x16x64xbf16>
    %33 = vector.shape_cast %32 : vector<1x1x16x64xbf16> to vector<16x64xbf16>
    %34 = vector.shape_cast %31 : vector<16x64xbf16> to vector<1x1x16x64xbf16>
    tpu.vector_store %arg3[%c2_21, %c1_22, %c0_23, %c0_24], %34 {strides = array<i32>} : memref<3x2x16x64xbf16, #tpu.memory_space<vmem>>, vector<1x1x16x64xbf16>,
    return
  }
  func.func @transform_0(%arg0: i32) -> (i32, i32) {
    %c0_i32 = arith.constant 0 : i32
    %c0_i32_0 = arith.constant 0 : i32
    return %arg0, %c0_i32 : i32, i32
  }
  func.func @transform_1(%arg0: i32) -> (i32, i32) {
    %c0_i32 = arith.constant 0 : i32
    %c0_i32_0 = arith.constant 0 : i32
    %c0_i32_1 = arith.constant 0 : i32
    return %c0_i32, %c0_i32_0 : i32, i32
  }
  func.func @transform_2(%arg0: i32) -> (i32, i32, i32, i32) {
    %c0_i32 = arith.constant 0 : i32
    %c0_i32_0 = arith.constant 0 : i32
    %c0_i32_1 = arith.constant 0 : i32
    %c0_i32_2 = arith.constant 0 : i32
    return %c0_i32, %c0_i32_0, %arg0, %c0_i32_1 : i32, i32, i32, i32
  }
}

module attributes {stable_mosaic.version = 11 : i64} {
  func.func @_landmark_kernel(%arg0: i32, %arg1: memref<8x2x64xbf16, #tpu.memory_space<vmem>>, %arg2: memref<8x2x64xbf16, #tpu.memory_space<vmem>>, %arg3: memref<1x8x64xf32, #tpu.memory_space<vmem>>, %arg4: memref<1x8x64xf32, #tpu.memory_space<vmem>>, %arg5: memref<1x8x8xf32, #tpu.memory_space<vmem>>) attributes {dimension_semantics = [#tpu.dimension_semantics<parallel>], iteration_bounds = array<i64: 4>, scalar_prefetch = 0 : i64, scratch_operands = 0 : i64, tpu.core_type = #tpu.core_type<tc>, window_params = [{transform_indices = @transform_0, window_bounds = array<i64: 8, 2, 64>}, {transform_indices = @transform_1, window_bounds = array<i64: 8, 2, 64>}, {transform_indices = @transform_2, window_bounds = array<i64: 1, 8, 64>}, {transform_indices = @transform_3, window_bounds = array<i64: 1, 8, 64>}, {transform_indices = @transform_4, window_bounds = array<i64: 1, 8, 8>}]} {
    %c0 = arith.constant 0 : index
    %c0_0 = arith.constant 0 : index
    %c0_1 = arith.constant 0 : index
    %0 = vector.load %arg1[%c0, %c0_0, %c0_1] : memref<8x2x64xbf16, #tpu.memory_space<vmem>>, vector<8x2x64xbf16>
    %1 = arith.extf %0 : vector<8x2x64xbf16> to vector<8x2x64xf32>
    %c0_2 = arith.constant 0 : index
    %c0_3 = arith.constant 0 : index
    %c0_4 = arith.constant 0 : index
    %2 = vector.load %arg2[%c0_2, %c0_3, %c0_4] : memref<8x2x64xbf16, #tpu.memory_space<vmem>>, vector<8x2x64xbf16>
    %3 = arith.extf %2 : vector<8x2x64xbf16> to vector<8x2x64xf32>
    %cst = arith.constant dense<0.000000e+00> : vector<8x64xf32>
    %4 = vector.multi_reduction <add>, %1, %cst [1] : vector<8x2x64xf32> to vector<8x64xf32>
    %cst_5 = arith.constant 6.250000e-02 : f32
    %5 = vector.broadcast %cst_5 : f32 to vector<8x64xf32>
    %6 = arith.mulf %4, %5 : vector<8x64xf32>
    %cst_6 = arith.constant dense<0.000000e+00> : vector<8x64xf32>
    %7 = vector.multi_reduction <add>, %3, %cst_6 [1] : vector<8x2x64xf32> to vector<8x64xf32>
    %cst_7 = arith.constant 5.000000e-01 : f32
    %8 = vector.broadcast %cst_7 : f32 to vector<8x64xf32>
    %9 = arith.mulf %7, %8 : vector<8x64xf32>
    %c0_8 = arith.constant 0 : index
    %c0_9 = arith.constant 0 : index
    %c0_10 = arith.constant 0 : index
    %10 = vector.load %arg3[%c0_8, %c0_9, %c0_10] : memref<1x8x64xf32, #tpu.memory_space<vmem>>, vector<1x8x64xf32>
    %11 = vector.shape_cast %10 : vector<1x8x64xf32> to vector<8x64xf32>
    %12 = vector.shape_cast %6 : vector<8x64xf32> to vector<1x8x64xf32>
    tpu.vector_store %arg3[%c0_8, %c0_9, %c0_10], %12 {strides = array<i32>} : memref<1x8x64xf32, #tpu.memory_space<vmem>>, vector<1x8x64xf32>,
    %c0_11 = arith.constant 0 : index
    %c0_12 = arith.constant 0 : index
    %c0_13 = arith.constant 0 : index
    %13 = vector.load %arg4[%c0_11, %c0_12, %c0_13] : memref<1x8x64xf32, #tpu.memory_space<vmem>>, vector<1x8x64xf32>
    %14 = vector.shape_cast %13 : vector<1x8x64xf32> to vector<8x64xf32>
    %15 = vector.shape_cast %9 : vector<8x64xf32> to vector<1x8x64xf32>
    tpu.vector_store %arg4[%c0_11, %c0_12, %c0_13], %15 {strides = array<i32>} : memref<1x8x64xf32, #tpu.memory_space<vmem>>, vector<1x8x64xf32>,
    %cst_14 = arith.constant dense<0.000000e+00> : vector<8x8xf32>
    %16 = tpu.matmul %6, %9, %cst_14 {dimension_numbers = #tpu.dot_dimension_numbers<[1], [1], [0], [0], [0, 0, 1, 0], [], []>} : vector<8x64xf32>, vector<8x64xf32>, vector<8x8xf32> -> vector<8x8xf32>
    %cst_15 = arith.constant dense<0xFF800000> : vector<8xf32>
    %17 = vector.multi_reduction <maximumf>, %16, %cst_15 [1] : vector<8x8xf32> to vector<8xf32>
    %18 = vector.shape_cast %17 : vector<8xf32> to vector<8x1xf32>
    %19 = vector.broadcast %18 : vector<8x1xf32> to vector<8x8xf32>
    %20 = arith.subf %16, %19 : vector<8x8xf32>
    %21 = math.exp %20 : vector<8x8xf32>
    %cst_16 = arith.constant dense<0.000000e+00> : vector<8xf32>
    %22 = vector.multi_reduction <add>, %21, %cst_16 [1] : vector<8x8xf32> to vector<8xf32>
    %23 = vector.shape_cast %22 : vector<8xf32> to vector<8x1xf32>
    %24 = vector.broadcast %23 : vector<8x1xf32> to vector<8x8xf32>
    %25 = arith.divf %21, %24 : vector<8x8xf32>
    %c0_17 = arith.constant 0 : index
    %c0_18 = arith.constant 0 : index
    %c0_19 = arith.constant 0 : index
    %26 = vector.load %arg5[%c0_17, %c0_18, %c0_19] : memref<1x8x8xf32, #tpu.memory_space<vmem>>, vector<1x8x8xf32>
    %27 = vector.shape_cast %26 : vector<1x8x8xf32> to vector<8x8xf32>
    %28 = vector.shape_cast %25 : vector<8x8xf32> to vector<1x8x8xf32>
    tpu.vector_store %arg5[%c0_17, %c0_18, %c0_19], %28 {strides = array<i32>} : memref<1x8x8xf32, #tpu.memory_space<vmem>>, vector<1x8x8xf32>,
    return
  }
  func.func @transform_0(%arg0: i32) -> (i32, i32, i32) {
    %c0_i32 = arith.constant 0 : i32
    %c0_i32_0 = arith.constant 0 : i32
    %c0_i32_1 = arith.constant 0 : i32
    return %arg0, %c0_i32, %c0_i32_0 : i32, i32, i32
  }
  func.func @transform_1(%arg0: i32) -> (i32, i32, i32) {
    %c0_i32 = arith.constant 0 : i32
    %c0_i32_0 = arith.constant 0 : i32
    %c0_i32_1 = arith.constant 0 : i32
    return %arg0, %c0_i32, %c0_i32_0 : i32, i32, i32
  }
  func.func @transform_2(%arg0: i32) -> (i32, i32, i32) {
    %c0_i32 = arith.constant 0 : i32
    %c0_i32_0 = arith.constant 0 : i32
    %c0_i32_1 = arith.constant 0 : i32
    return %arg0, %c0_i32, %c0_i32_0 : i32, i32, i32
  }
  func.func @transform_3(%arg0: i32) -> (i32, i32, i32) {
    %c0_i32 = arith.constant 0 : i32
    %c0_i32_0 = arith.constant 0 : i32
    %c0_i32_1 = arith.constant 0 : i32
    return %arg0, %c0_i32, %c0_i32_0 : i32, i32, i32
  }
  func.func @transform_4(%arg0: i32) -> (i32, i32, i32) {
    %c0_i32 = arith.constant 0 : i32
    %c0_i32_0 = arith.constant 0 : i32
    %c0_i32_1 = arith.constant 0 : i32
    return %arg0, %c0_i32, %c0_i32_0 : i32, i32, i32
  }
}

module attributes {stable_mosaic.version = 11 : i64} {
  func.func @_pinv_kernel(%arg0: i32, %arg1: memref<1x1xf32, #tpu.memory_space<smem>>, %arg2: memref<1x8x8xf32, #tpu.memory_space<vmem>>, %arg3: memref<1x8x8xf32, #tpu.memory_space<vmem>>) attributes {dimension_semantics = [#tpu.dimension_semantics<parallel>], iteration_bounds = array<i64: 4>, scalar_prefetch = 0 : i64, scratch_operands = 0 : i64, tpu.core_type = #tpu.core_type<tc>, window_params = [{transform_indices = @transform_0, window_bounds = array<i64: 1, 1>}, {transform_indices = @transform_1, window_bounds = array<i64: 1, 8, 8>}, {transform_indices = @transform_2, window_bounds = array<i64: 1, 8, 8>}]} {
    %c0 = arith.constant 0 : index
    %c0_0 = arith.constant 0 : index
    %c0_1 = arith.constant 0 : index
    %0 = vector.load %arg2[%c0, %c0_0, %c0_1] : memref<1x8x8xf32, #tpu.memory_space<vmem>>, vector<1x8x8xf32>
    %1 = vector.shape_cast %0 : vector<1x8x8xf32> to vector<8x8xf32>
    %2 = tpu.iota {dimensions = array<i32: 0>} : vector<8x8xi32>
    %3 = tpu.iota {dimensions = array<i32: 1>} : vector<8x8xi32>
    %4 = arith.cmpi eq, %2, %3 : vector<8x8xi32>
    %5 = arith.extui %4 : vector<8x8xi1> to vector<8x8xi32>
    %6 = arith.sitofp %5 : vector<8x8xi32> to vector<8x8xf32>
    %7 = tpu.transpose %1, [1, 0] : vector<8x8xf32> -> vector<8x8xf32>
    %c0_2 = arith.constant 0 : index
    %c0_3 = arith.constant 0 : index
    %8 = memref.load %arg1[%c0_2, %c0_3] : memref<1x1xf32, #tpu.memory_space<smem>>
    %9 = vector.broadcast %8 : f32 to vector<8x8xf32>
    %10 = arith.mulf %7, %9 : vector<8x8xf32>
    %cst = arith.constant dense<0.000000e+00> : vector<8x8xf32>
    %11 = tpu.matmul %1, %10, %cst {dimension_numbers = #tpu.dot_dimension_numbers<[1], [0], [0], [1], [0, 0, 1, 1], [], []>} : vector<8x8xf32>, vector<8x8xf32>, vector<8x8xf32> -> vector<8x8xf32>
    %cst_4 = arith.constant 7.000000e+00 : f32
    %12 = vector.broadcast %cst_4 : f32 to vector<8x8xf32>
    %13 = arith.mulf %12, %6 : vector<8x8xf32>
    %14 = arith.subf %13, %11 : vector<8x8xf32>
    %cst_5 = arith.constant 1.500000e+01 : f32
    %15 = vector.broadcast %cst_5 : f32 to vector<8x8xf32>
    %16 = arith.mulf %15, %6 : vector<8x8xf32>
    %cst_6 = arith.constant dense<0.000000e+00> : vector<8x8xf32>
    %17 = tpu.matmul %11, %14, %cst_6 {dimension_numbers = #tpu.dot_dimension_numbers<[1], [0], [0], [1], [0, 0, 1, 1], [], []>} : vector<8x8xf32>, vector<8x8xf32>, vector<8x8xf32> -> vector<8x8xf32>
    %18 = arith.subf %16, %17 : vector<8x8xf32>
    %cst_7 = arith.constant 1.300000e+01 : f32
    %19 = vector.broadcast %cst_7 : f32 to vector<8x8xf32>
    %20 = arith.mulf %19, %6 : vector<8x8xf32>
    %cst_8 = arith.constant dense<0.000000e+00> : vector<8x8xf32>
    %21 = tpu.matmul %11, %18, %cst_8 {dimension_numbers = #tpu.dot_dimension_numbers<[1], [0], [0], [1], [0, 0, 1, 1], [], []>} : vector<8x8xf32>, vector<8x8xf32>, vector<8x8xf32> -> vector<8x8xf32>
    %22 = arith.subf %20, %21 : vector<8x8xf32>
    %cst_9 = arith.constant dense<0.000000e+00> : vector<8x8xf32>
    %23 = tpu.matmul %10, %22, %cst_9 {dimension_numbers = #tpu.dot_dimension_numbers<[1], [0], [0], [1], [0, 0, 1, 1], [], []>} : vector<8x8xf32>, vector<8x8xf32>, vector<8x8xf32> -> vector<8x8xf32>
    %cst_10 = arith.constant 2.500000e-01 : f32
    %24 = vector.broadcast %cst_10 : f32 to vector<8x8xf32>
    %25 = arith.mulf %24, %23 : vector<8x8xf32>
    %cst_11 = arith.constant dense<0.000000e+00> : vector<8x8xf32>
    %26 = tpu.matmul %1, %25, %cst_11 {dimension_numbers = #tpu.dot_dimension_numbers<[1], [0], [0], [1], [0, 0, 1, 1], [], []>} : vector<8x8xf32>, vector<8x8xf32>, vector<8x8xf32> -> vector<8x8xf32>
    %cst_12 = arith.constant 7.000000e+00 : f32
    %27 = vector.broadcast %cst_12 : f32 to vector<8x8xf32>
    %28 = arith.mulf %27, %6 : vector<8x8xf32>
    %29 = arith.subf %28, %26 : vector<8x8xf32>
    %cst_13 = arith.constant 1.500000e+01 : f32
    %30 = vector.broadcast %cst_13 : f32 to vector<8x8xf32>
    %31 = arith.mulf %30, %6 : vector<8x8xf32>
    %cst_14 = arith.constant dense<0.000000e+00> : vector<8x8xf32>
    %32 = tpu.matmul %26, %29, %cst_14 {dimension_numbers = #tpu.dot_dimension_numbers<[1], [0], [0], [1], [0, 0, 1, 1], [], []>} : vector<8x8xf32>, vector<8x8xf32>, vector<8x8xf32> -> vector<8x8xf32>
    %33 = arith.subf %31, %32 : vector<8x8xf32>
    %cst_15 = arith.constant 1.300000e+01 : f32
    %34 = vector.broadcast %cst_15 : f32 to vector<8x8xf32>
    %35 = arith.mulf %34, %6 : vector<8x8xf32>
    %cst_16 = arith.constant dense<0.000000e+00> : vector<8x8xf32>
    %36 = tpu.matmul %26, %33, %cst_16 {dimension_numbers = #tpu.dot_dimension_numbers<[1], [0], [0], [1], [0, 0, 1, 1], [], []>} : vector<8x8xf32>, vector<8x8xf32>, vector<8x8xf32> -> vector<8x8xf32>
    %37 = arith.subf %35, %36 : vector<8x8xf32>
    %cst_17 = arith.constant dense<0.000000e+00> : vector<8x8xf32>
    %38 = tpu.matmul %25, %37, %cst_17 {dimension_numbers = #tpu.dot_dimension_numbers<[1], [0], [0], [1], [0, 0, 1, 1], [], []>} : vector<8x8xf32>, vector<8x8xf32>, vector<8x8xf32> -> vector<8x8xf32>
    %cst_18 = arith.constant 2.500000e-01 : f32
    %39 = vector.broadcast %cst_18 : f32 to vector<8x8xf32>
    %40 = arith.mulf %39, %38 : vector<8x8xf32>
    %cst_19 = arith.constant dense<0.000000e+00> : vector<8x8xf32>
    %41 = tpu.matmul %1, %40, %cst_19 {dimension_numbers = #tpu.dot_dimension_numbers<[1], [0], [0], [1], [0, 0, 1, 1], [], []>} : vector<8x8xf32>, vector<8x8xf32>, vector<8x8xf32> -> vector<8x8xf32>
    %cst_20 = arith.constant 7.000000e+00 : f32
    %42 = vector.broadcast %cst_20 : f32 to vector<8x8xf32>
    %43 = arith.mulf %42, %6 : vector<8x8xf32>
    %44 = arith.subf %43, %41 : vector<8x8xf32>
    %cst_21 = arith.constant 1.500000e+01 : f32
    %45 = vector.broadcast %cst_21 : f32 to vector<8x8xf32>
    %46 = arith.mulf %45, %6 : vector<8x8xf32>
    %cst_22 = arith.constant dense<0.000000e+00> : vector<8x8xf32>
    %47 = tpu.matmul %41, %44, %cst_22 {dimension_numbers = #tpu.dot_dimension_numbers<[1], [0], [0], [1], [0, 0, 1, 1], [], []>} : vector<8x8xf32>, vector<8x8xf32>, vector<8x8xf32> -> vector<8x8xf32>
    %48 = arith.subf %46, %47 : vector<8x8xf32>
    %cst_23 = arith.constant 1.300000e+01 : f32
    %49 = vector.broadcast %cst_23 : f32 to vector<8x8xf32>
    %50 = arith.mulf %49, %6 : vector<8x8xf32>
    %cst_24 = arith.constant dense<0.000000e+00> : vector<8x8xf32>
    %51 = tpu.matmul %41, %48, %cst_24 {dimension_numbers = #tpu.dot_dimension_numbers<[1], [0], [0], [1], [0, 0, 1, 1], [], []>} : vector<8x8xf32>, vector<8x8xf32>, vector<8x8xf32> -> vector<8x8xf32>
    %52 = arith.subf %50, %51 : vector<8x8xf32>
    %cst_25 = arith.constant dense<0.000000e+00> : vector<8x8xf32>
    %53 = tpu.matmul %40, %52, %cst_25 {dimension_numbers = #tpu.dot_dimension_numbers<[1], [0], [0], [1], [0, 0, 1, 1], [], []>} : vector<8x8xf32>, vector<8x8xf32>, vector<8x8xf32> -> vector<8x8xf32>
    %cst_26 = arith.constant 2.500000e-01 : f32
    %54 = vector.broadcast %cst_26 : f32 to vector<8x8xf32>
    %55 = arith.mulf %54, %53 : vector<8x8xf32>
    %cst_27 = arith.constant dense<0.000000e+00> : vector<8x8xf32>
    %56 = tpu.matmul %1, %55, %cst_27 {dimension_numbers = #tpu.dot_dimension_numbers<[1], [0], [0], [1], [0, 0, 1, 1], [], []>} : vector<8x8xf32>, vector<8x8xf32>, vector<8x8xf32> -> vector<8x8xf32>
    %cst_28 = arith.constant 7.000000e+00 : f32
    %57 = vector.broadcast %cst_28 : f32 to vector<8x8xf32>
    %58 = arith.mulf %57, %6 : vector<8x8xf32>
    %59 = arith.subf %58, %56 : vector<8x8xf32>
    %cst_29 = arith.constant 1.500000e+01 : f32
    %60 = vector.broadcast %cst_29 : f32 to vector<8x8xf32>
    %61 = arith.mulf %60, %6 : vector<8x8xf32>
    %cst_30 = arith.constant dense<0.000000e+00> : vector<8x8xf32>
    %62 = tpu.matmul %56, %59, %cst_30 {dimension_numbers = #tpu.dot_dimension_numbers<[1], [0], [0], [1], [0, 0, 1, 1], [], []>} : vector<8x8xf32>, vector<8x8xf32>, vector<8x8xf32> -> vector<8x8xf32>
    %63 = arith.subf %61, %62 : vector<8x8xf32>
    %cst_31 = arith.constant 1.300000e+01 : f32
    %64 = vector.broadcast %cst_31 : f32 to vector<8x8xf32>
    %65 = arith.mulf %64, %6 : vector<8x8xf32>
    %cst_32 = arith.constant dense<0.000000e+00> : vector<8x8xf32>
    %66 = tpu.matmul %56, %63, %cst_32 {dimension_numbers = #tpu.dot_dimension_numbers<[1], [0], [0], [1], [0, 0, 1, 1], [], []>} : vector<8x8xf32>, vector<8x8xf32>, vector<8x8xf32> -> vector<8x8xf32>
    %67 = arith.subf %65, %66 : vector<8x8xf32>
    %cst_33 = arith.constant dense<0.000000e+00> : vector<8x8xf32>
    %68 = tpu.matmul %55, %67, %cst_33 {dimension_numbers = #tpu.dot_dimension_numbers<[1], [0], [0], [1], [0, 0, 1, 1], [], []>} : vector<8x8xf32>, vector<8x8xf32>, vector<8x8xf32> -> vector<8x8xf32>
    %cst_34 = arith.constant 2.500000e-01 : f32
    %69 = vector.broadcast %cst_34 : f32 to vector<8x8xf32>
    %70 = arith.mulf %69, %68 : vector<8x8xf32>
    %cst_35 = arith.constant dense<0.000000e+00> : vector<8x8xf32>
    %71 = tpu.matmul %1, %70, %cst_35 {dimension_numbers = #tpu.dot_dimension_numbers<[1], [0], [0], [1], [0, 0, 1, 1], [], []>} : vector<8x8xf32>, vector<8x8xf32>, vector<8x8xf32> -> vector<8x8xf32>
    %cst_36 = arith.constant 7.000000e+00 : f32
    %72 = vector.broadcast %cst_36 : f32 to vector<8x8xf32>
    %73 = arith.mulf %72, %6 : vector<8x8xf32>
    %74 = arith.subf %73, %71 : vector<8x8xf32>
    %cst_37 = arith.constant 1.500000e+01 : f32
    %75 = vector.broadcast %cst_37 : f32 to vector<8x8xf32>
    %76 = arith.mulf %75, %6 : vector<8x8xf32>
    %cst_38 = arith.constant dense<0.000000e+00> : vector<8x8xf32>
    %77 = tpu.matmul %71, %74, %cst_38 {dimension_numbers = #tpu.dot_dimension_numbers<[1], [0], [0], [1], [0, 0, 1, 1], [], []>} : vector<8x8xf32>, vector<8x8xf32>, vector<8x8xf32> -> vector<8x8xf32>
    %78 = arith.subf %76, %77 : vector<8x8xf32>
    %cst_39 = arith.constant 1.300000e+01 : f32
    %79 = vector.broadcast %cst_39 : f32 to vector<8x8xf32>
    %80 = arith.mulf %79, %6 : vector<8x8xf32>
    %cst_40 = arith.constant dense<0.000000e+00> : vector<8x8xf32>
    %81 = tpu.matmul %71, %78, %cst_40 {dimension_numbers = #tpu.dot_dimension_numbers<[1], [0], [0], [1], [0, 0, 1, 1], [], []>} : vector<8x8xf32>, vector<8x8xf32>, vector<8x8xf32> -> vector<8x8xf32>
    %82 = arith.subf %80, %81 : vector<8x8xf32>
    %cst_41 = arith.constant dense<0.000000e+00> : vector<8x8xf32>
    %83 = tpu.matmul %70, %82, %cst_41 {dimension_numbers = #tpu.dot_dimension_numbers<[1], [0], [0], [1], [0, 0, 1, 1], [], []>} : vector<8x8xf32>, vector<8x8xf32>, vector<8x8xf32> -> vector<8x8xf32>
    %cst_42 = arith.constant 2.500000e-01 : f32
    %84 = vector.broadcast %cst_42 : f32 to vector<8x8xf32>
    %85 = arith.mulf %84, %83 : vector<8x8xf32>
    %cst_43 = arith.constant dense<0.000000e+00> : vector<8x8xf32>
    %86 = tpu.matmul %1, %85, %cst_43 {dimension_numbers = #tpu.dot_dimension_numbers<[1], [0], [0], [1], [0, 0, 1, 1], [], []>} : vector<8x8xf32>, vector<8x8xf32>, vector<8x8xf32> -> vector<8x8xf32>
    %cst_44 = arith.constant 7.000000e+00 : f32
    %87 = vector.broadcast %cst_44 : f32 to vector<8x8xf32>
    %88 = arith.mulf %87, %6 : vector<8x8xf32>
    %89 = arith.subf %88, %86 : vector<8x8xf32>
    %cst_45 = arith.constant 1.500000e+01 : f32
    %90 = vector.broadcast %cst_45 : f32 to vector<8x8xf32>
    %91 = arith.mulf %90, %6 : vector<8x8xf32>
    %cst_46 = arith.constant dense<0.000000e+00> : vector<8x8xf32>
    %92 = tpu.matmul %86, %89, %cst_46 {dimension_numbers = #tpu.dot_dimension_numbers<[1], [0], [0], [1], [0, 0, 1, 1], [], []>} : vector<8x8xf32>, vector<8x8xf32>, vector<8x8xf32> -> vector<8x8xf32>
    %93 = arith.subf %91, %92 : vector<8x8xf32>
    %cst_47 = arith.constant 1.300000e+01 : f32
    %94 = vector.broadcast %cst_47 : f32 to vector<8x8xf32>
    %95 = arith.mulf %94, %6 : vector<8x8xf32>
    %cst_48 = arith.constant dense<0.000000e+00> : vector<8x8xf32>
    %96 = tpu.matmul %86, %93, %cst_48 {dimension_numbers = #tpu.dot_dimension_numbers<[1], [0], [0], [1], [0, 0, 1, 1], [], []>} : vector<8x8xf32>, vector<8x8xf32>, vector<8x8xf32> -> vector<8x8xf32>
    %97 = arith.subf %95, %96 : vector<8x8xf32>
    %cst_49 = arith.constant dense<0.000000e+00> : vector<8x8xf32>
    %98 = tpu.matmul %85, %97, %cst_49 {dimension_numbers = #tpu.dot_dimension_numbers<[1], [0], [0], [1], [0, 0, 1, 1], [], []>} : vector<8x8xf32>, vector<8x8xf32>, vector<8x8xf32> -> vector<8x8xf32>
    %cst_50 = arith.constant 2.500000e-01 : f32
    %99 = vector.broadcast %cst_50 : f32 to vector<8x8xf32>
    %100 = arith.mulf %99, %98 : vector<8x8xf32>
    %c0_51 = arith.constant 0 : index
    %c0_52 = arith.constant 0 : index
    %c0_53 = arith.constant 0 : index
    %101 = vector.load %arg3[%c0_51, %c0_52, %c0_53] : memref<1x8x8xf32, #tpu.memory_space<vmem>>, vector<1x8x8xf32>
    %102 = vector.shape_cast %101 : vector<1x8x8xf32> to vector<8x8xf32>
    %103 = vector.shape_cast %100 : vector<8x8xf32> to vector<1x8x8xf32>
    tpu.vector_store %arg3[%c0_51, %c0_52, %c0_53], %103 {strides = array<i32>} : memref<1x8x8xf32, #tpu.memory_space<vmem>>, vector<1x8x8xf32>,
    return
  }
  func.func @transform_0(%arg0: i32) -> (i32, i32) {
    %c0_i32 = arith.constant 0 : i32
    %c0_i32_0 = arith.constant 0 : i32
    %c0_i32_1 = arith.constant 0 : i32
    return %c0_i32, %c0_i32_0 : i32, i32
  }
  func.func @transform_1(%arg0: i32) -> (i32, i32, i32) {
    %c0_i32 = arith.constant 0 : i32
    %c0_i32_0 = arith.constant 0 : i32
    %c0_i32_1 = arith.constant 0 : i32
    return %arg0, %c0_i32, %c0_i32_0 : i32, i32, i32
  }
  func.func @transform_2(%arg0: i32) -> (i32, i32, i32) {
    %c0_i32 = arith.constant 0 : i32
    %c0_i32_0 = arith.constant 0 : i32
    %c0_i32_1 = arith.constant 0 : i32
    return %arg0, %c0_i32, %c0_i32_0 : i32, i32, i32
  }
}

module attributes {stable_mosaic.version = 11 : i64} {
  func.func @_kv_stage_kernel(%arg0: i32, %arg1: i32, %arg2: memref<1x8x64xf32, #tpu.memory_space<vmem>>, %arg3: memref<1x8x8xf32, #tpu.memory_space<vmem>>, %arg4: memref<1x8x64xbf16, #tpu.memory_space<vmem>>, %arg5: memref<1x8x64xbf16, #tpu.memory_space<vmem>>, %arg6: memref<1x8x64xf32, #tpu.memory_space<vmem>>, %arg7: memref<8x1xf32, #tpu.memory_space<vmem>>, %arg8: memref<8x1xf32, #tpu.memory_space<vmem>>, %arg9: memref<8x64xf32, #tpu.memory_space<vmem>>) attributes {dimension_semantics = [#tpu.dimension_semantics<parallel>, #tpu.dimension_semantics<arbitrary>], iteration_bounds = array<i64: 4, 2>, scalar_prefetch = 0 : i64, scratch_operands = 3 : i64, tpu.core_type = #tpu.core_type<tc>, window_params = [{transform_indices = @transform_0, window_bounds = array<i64: 1, 8, 64>}, {transform_indices = @transform_1, window_bounds = array<i64: 1, 8, 8>}, {transform_indices = @transform_2, window_bounds = array<i64: 1, 8, 64>}, {transform_indices = @transform_3, window_bounds = array<i64: 1, 8, 64>}, {transform_indices = @transform_4, window_bounds = array<i64: 1, 8, 64>}]} {
    %c0_i32 = arith.constant 0 : i32
    %0 = arith.cmpi eq, %arg1, %c0_i32 : i32
    %1 = arith.extui %0 : i1 to i32
    %c0_i32_0 = arith.constant 0 : i32
    %2 = arith.cmpi ne, %1, %c0_i32_0 : i32
    scf.if %2 {
      %cst_27 = arith.constant 0xFF800000 : f32
      %38 = vector.broadcast %cst_27 : f32 to vector<8x1xf32>
      %c0_28 = arith.constant 0 : index
      %c0_29 = arith.constant 0 : index
      %39 = vector.load %arg7[%c0_28, %c0_29] : memref<8x1xf32, #tpu.memory_space<vmem>>, vector<8x1xf32>
      tpu.vector_store %arg7[%c0_28, %c0_29], %38 {strides = array<i32>} : memref<8x1xf32, #tpu.memory_space<vmem>>, vector<8x1xf32>,
      %cst_30 = arith.constant 0.000000e+00 : f32
      %40 = vector.broadcast %cst_30 : f32 to vector<8x1xf32>
      %c0_31 = arith.constant 0 : index
      %c0_32 = arith.constant 0 : index
      %41 = vector.load %arg8[%c0_31, %c0_32] : memref<8x1xf32, #tpu.memory_space<vmem>>, vector<8x1xf32>
      tpu.vector_store %arg8[%c0_31, %c0_32], %40 {strides = array<i32>} : memref<8x1xf32, #tpu.memory_space<vmem>>, vector<8x1xf32>,
      %cst_33 = arith.constant 0.000000e+00 : f32
      %42 = vector.broadcast %cst_33 : f32 to vector<8x64xf32>
      %c0_34 = arith.constant 0 : index
      %c0_35 = arith.constant 0 : index
      %43 = vector.load %arg9[%c0_34, %c0_35] : memref<8x64xf32, #tpu.memory_space<vmem>>, vector<8x64xf32>
      tpu.vector_store %arg9[%c0_34, %c0_35], %42 {strides = array<i32>} : memref<8x64xf32, #tpu.memory_space<vmem>>, vector<8x64xf32>,
    } else {
    }
    %c0 = arith.constant 0 : index
    %c0_1 = arith.constant 0 : index
    %c0_2 = arith.constant 0 : index
    %3 = vector.load %arg2[%c0, %c0_1, %c0_2] : memref<1x8x64xf32, #tpu.memory_space<vmem>>, vector<1x8x64xf32>
    %4 = vector.shape_cast %3 : vector<1x8x64xf32> to vector<8x64xf32>
    %5 = arith.truncf %4 : vector<8x64xf32> to vector<8x64xbf16>
    %c0_3 = arith.constant 0 : index
    %c0_4 = arith.constant 0 : index
    %c0_5 = arith.constant 0 : index
    %6 = vector.load %arg4[%c0_3, %c0_4, %c0_5] : memref<1x8x64xbf16, #tpu.memory_space<vmem>>, vector<1x8x64xbf16>
    %7 = vector.shape_cast %6 : vector<1x8x64xbf16> to vector<8x64xbf16>
    %cst = arith.constant dense<0.000000e+00> : vector<8x8xf32>
    %8 = tpu.matmul %5, %7, %cst {dimension_numbers = #tpu.dot_dimension_numbers<[1], [1], [0], [0], [0, 0, 1, 0], [], []>} : vector<8x64xbf16>, vector<8x64xbf16>, vector<8x8xf32> -> vector<8x8xf32>
    %c0_6 = arith.constant 0 : index
    %c0_7 = arith.constant 0 : index
    %9 = vector.load %arg7[%c0_6, %c0_7] : memref<8x1xf32, #tpu.memory_space<vmem>>, vector<8x1xf32>
    %cst_8 = arith.constant dense<0xFF800000> : vector<8xf32>
    %10 = vector.multi_reduction <maximumf>, %8, %cst_8 [1] : vector<8x8xf32> to vector<8xf32>
    %11 = vector.shape_cast %10 : vector<8xf32> to vector<8x1xf32>
    %12 = arith.maximumf %9, %11 : vector<8x1xf32>
    %c0_9 = arith.constant 0 : index
    %c0_10 = arith.constant 0 : index
    %13 = vector.load %arg7[%c0_9, %c0_10] : memref<8x1xf32, #tpu.memory_space<vmem>>, vector<8x1xf32>
    %14 = arith.subf %13, %12 : vector<8x1xf32>
    %15 = math.exp %14 : vector<8x1xf32>
    %16 = vector.broadcast %12 : vector<8x1xf32> to vector<8x8xf32>
    %17 = arith.subf %8, %16 : vector<8x8xf32>
    %18 = math.exp %17 : vector<8x8xf32>
    %c0_11 = arith.constant 0 : index
    %c0_12 = arith.constant 0 : index
    %19 = vector.load %arg8[%c0_11, %c0_12] : memref<8x1xf32, #tpu.memory_space<vmem>>, vector<8x1xf32>
    %20 = arith.mulf %19, %15 : vector<8x1xf32>
    %cst_13 = arith.constant dense<0.000000e+00> : vector<8xf32>
    %21 = vector.multi_reduction <add>, %18, %cst_13 [1] : vector<8x8xf32> to vector<8xf32>
    %22 = vector.shape_cast %21 : vector<8xf32> to vector<8x1xf32>
    %23 = arith.addf %20, %22 : vector<8x1xf32>
    %c0_14 = arith.constant 0 : index
    %c0_15 = arith.constant 0 : index
    %24 = vector.load %arg8[%c0_14, %c0_15] : memref<8x1xf32, #tpu.memory_space<vmem>>, vector<8x1xf32>
    tpu.vector_store %arg8[%c0_14, %c0_15], %23 {strides = array<i32>} : memref<8x1xf32, #tpu.memory_space<vmem>>, vector<8x1xf32>,
    %c0_16 = arith.constant 0 : index
    %c0_17 = arith.constant 0 : index
    %25 = vector.load %arg9[%c0_16, %c0_17] : memref<8x64xf32, #tpu.memory_space<vmem>>, vector<8x64xf32>
    %26 = vector.broadcast %15 : vector<8x1xf32> to vector<8x64xf32>
    %27 = arith.mulf %25, %26 : vector<8x64xf32>
    %28 = arith.truncf %18 : vector<8x8xf32> to vector<8x8xbf16>
    %c0_18 = arith.constant 0 : index
    %c0_19 = arith.constant 0 : index
    %c0_20 = arith.constant 0 : index
    %29 = vector.load %arg5[%c0_18, %c0_19, %c0_20] : memref<1x8x64xbf16, #tpu.memory_space<vmem>>, vector<1x8x64xbf16>
    %30 = vector.shape_cast %29 : vector<1x8x64xbf16> to vector<8x64xbf16>
    %cst_21 = arith.constant dense<0.000000e+00> : vector<8x64xf32>
    %31 = tpu.matmul %28, %30, %cst_21 {dimension_numbers = #tpu.dot_dimension_numbers<[1], [0], [0], [1], [0, 0, 1, 1], [], []>} : vector<8x8xbf16>, vector<8x64xbf16>, vector<8x64xf32> -> vector<8x64xf32>
    %32 = arith.addf %27, %31 : vector<8x64xf32>
    %c0_22 = arith.constant 0 : index
    %c0_23 = arith.constant 0 : index
    %33 = vector.load %arg9[%c0_22, %c0_23] : memref<8x64xf32, #tpu.memory_space<vmem>>, vector<8x64xf32>
    tpu.vector_store %arg9[%c0_22, %c0_23], %32 {strides = array<i32>} : memref<8x64xf32, #tpu.memory_space<vmem>>, vector<8x64xf32>,
    %c0_24 = arith.constant 0 : index
    %c0_25 = arith.constant 0 : index
    %34 = vector.load %arg7[%c0_24, %c0_25] : memref<8x1xf32, #tpu.memory_space<vmem>>, vector<8x1xf32>
    tpu.vector_store %arg7[%c0_24, %c0_25], %12 {strides = array<i32>} : memref<8x1xf32, #tpu.memory_space<vmem>>, vector<8x1xf32>,
    %c1_i32 = arith.constant 1 : i32
    %35 = arith.cmpi eq, %arg1, %c1_i32 : i32
    %36 = arith.extui %35 : i1 to i32
    %c0_i32_26 = arith.constant 0 : i32
    %37 = arith.cmpi ne, %36, %c0_i32_26 : i32
    scf.if %37 {
      %c0_27 = arith.constant 0 : index
      %c0_28 = arith.constant 0 : index
      %38 = vector.load %arg9[%c0_27, %c0_28] : memref<8x64xf32, #tpu.memory_space<vmem>>, vector<8x64xf32>
      %c0_29 = arith.constant 0 : index
      %c0_30 = arith.constant 0 : index
      %39 = vector.load %arg8[%c0_29, %c0_30] : memref<8x1xf32, #tpu.memory_space<vmem>>, vector<8x1xf32>
      %40 = vector.broadcast %39 : vector<8x1xf32> to vector<8x64xf32>
      %41 = arith.divf %38, %40 : vector<8x64xf32>
      %c0_31 = arith.constant 0 : index
      %c0_32 = arith.constant 0 : index
      %c0_33 = arith.constant 0 : index
      %42 = vector.load %arg3[%c0_31, %c0_32, %c0_33] : memref<1x8x8xf32, #tpu.memory_space<vmem>>, vector<1x8x8xf32>
      %43 = vector.shape_cast %42 : vector<1x8x8xf32> to vector<8x8xf32>
      %cst_34 = arith.constant dense<0.000000e+00> : vector<8x64xf32>
      %44 = tpu.matmul %43, %41, %cst_34 {dimension_numbers = #tpu.dot_dimension_numbers<[1], [0], [0], [1], [0, 0, 1, 1], [], []>} : vector<8x8xf32>, vector<8x64xf32>, vector<8x64xf32> -> vector<8x64xf32>
      %c0_35 = arith.constant 0 : index
      %c0_36 = arith.constant 0 : index
      %c0_37 = arith.constant 0 : index
      %45 = vector.load %arg6[%c0_35, %c0_36, %c0_37] : memref<1x8x64xf32, #tpu.memory_space<vmem>>, vector<1x8x64xf32>
      %46 = vector.shape_cast %45 : vector<1x8x64xf32> to vector<8x64xf32>
      %47 = vector.shape_cast %44 : vector<8x64xf32> to vector<1x8x64xf32>
      tpu.vector_store %arg6[%c0_35, %c0_36, %c0_37], %47 {strides = array<i32>} : memref<1x8x64xf32, #tpu.memory_space<vmem>>, vector<1x8x64xf32>,
    } else {
    }
    return
  }
  func.func @transform_0(%arg0: i32, %arg1: i32) -> (i32, i32, i32) {
    %c0_i32 = arith.constant 0 : i32
    %c0_i32_0 = arith.constant 0 : i32
    %c0_i32_1 = arith.constant 0 : i32
    return %arg0, %c0_i32, %c0_i32_0 : i32, i32, i32
  }
  func.func @transform_1(%arg0: i32, %arg1: i32) -> (i32, i32, i32) {
    %c0_i32 = arith.constant 0 : i32
    %c0_i32_0 = arith.constant 0 : i32
    %c0_i32_1 = arith.constant 0 : i32
    return %arg0, %c0_i32, %c0_i32_0 : i32, i32, i32
  }
  func.func @transform_2(%arg0: i32, %arg1: i32) -> (i32, i32, i32) {
    %c0_i32 = arith.constant 0 : i32
    %c0_i32_0 = arith.constant 0 : i32
    return %arg0, %arg1, %c0_i32 : i32, i32, i32
  }
  func.func @transform_3(%arg0: i32, %arg1: i32) -> (i32, i32, i32) {
    %c0_i32 = arith.constant 0 : i32
    %c0_i32_0 = arith.constant 0 : i32
    return %arg0, %arg1, %c0_i32 : i32, i32, i32
  }
  func.func @transform_4(%arg0: i32, %arg1: i32) -> (i32, i32, i32) {
    %c0_i32 = arith.constant 0 : i32
    %c0_i32_0 = arith.constant 0 : i32
    %c0_i32_1 = arith.constant 0 : i32
    return %arg0, %c0_i32, %c0_i32_0 : i32, i32, i32
  }
}

module attributes {stable_mosaic.version = 11 : i64} {
  func.func @_q_stage_kernel(%arg0: i32, %arg1: i32, %arg2: memref<4xf32, #tpu.memory_space<smem>>, %arg3: memref<1x8x64xf32, #tpu.memory_space<vmem>>, %arg4: memref<1x8x64xf32, #tpu.memory_space<vmem>>, %arg5: memref<1x8x64xbf16, #tpu.memory_space<vmem>>, %arg6: memref<1x8x64xbf16, #tpu.memory_space<vmem>>, %arg7: memref<1x8x64xbf16, #tpu.memory_space<vmem>>) attributes {dimension_semantics = [#tpu.dimension_semantics<parallel>, #tpu.dimension_semantics<parallel>], iteration_bounds = array<i64: 4, 2>, scalar_prefetch = 0 : i64, scratch_operands = 0 : i64, tpu.core_type = #tpu.core_type<tc>, window_params = [{transform_indices = @transform_0, window_bounds = array<i64: 4>}, {transform_indices = @transform_1, window_bounds = array<i64: 1, 8, 64>}, {transform_indices = @transform_2, window_bounds = array<i64: 1, 8, 64>}, {transform_indices = @transform_3, window_bounds = array<i64: 1, 8, 64>}, {transform_indices = @transform_4, window_bounds = array<i64: 1, 8, 64>}, {transform_indices = @transform_5, window_bounds = array<i64: 1, 8, 64>}]} {
    %c0 = arith.constant 0 : index
    %c0_0 = arith.constant 0 : index
    %c0_1 = arith.constant 0 : index
    %0 = vector.load %arg3[%c0, %c0_0, %c0_1] : memref<1x8x64xf32, #tpu.memory_space<vmem>>, vector<1x8x64xf32>
    %1 = vector.shape_cast %0 : vector<1x8x64xf32> to vector<8x64xf32>
    %cst = arith.constant 1.250000e-01 : f32
    %2 = vector.broadcast %cst : f32 to vector<8x64xf32>
    %3 = arith.mulf %1, %2 : vector<8x64xf32>
    %4 = arith.truncf %3 : vector<8x64xf32> to vector<8x64xbf16>
    %c0_2 = arith.constant 0 : index
    %c0_3 = arith.constant 0 : index
    %c0_4 = arith.constant 0 : index
    %5 = vector.load %arg5[%c0_2, %c0_3, %c0_4] : memref<1x8x64xbf16, #tpu.memory_space<vmem>>, vector<1x8x64xbf16>
    %6 = vector.shape_cast %5 : vector<1x8x64xbf16> to vector<8x64xbf16>
    %cst_5 = arith.constant dense<0.000000e+00> : vector<8x8xf32>
    %7 = tpu.matmul %6, %4, %cst_5 {dimension_numbers = #tpu.dot_dimension_numbers<[1], [1], [0], [0], [0, 0, 1, 0], [], []>} : vector<8x64xbf16>, vector<8x64xbf16>, vector<8x8xf32> -> vector<8x8xf32>
    %cst_6 = arith.constant dense<0xFF800000> : vector<8xf32>
    %8 = vector.multi_reduction <maximumf>, %7, %cst_6 [1] : vector<8x8xf32> to vector<8xf32>
    %9 = vector.shape_cast %8 : vector<8xf32> to vector<8x1xf32>
    %10 = vector.broadcast %9 : vector<8x1xf32> to vector<8x8xf32>
    %11 = arith.subf %7, %10 : vector<8x8xf32>
    %12 = math.exp %11 : vector<8x8xf32>
    %cst_7 = arith.constant dense<0.000000e+00> : vector<8xf32>
    %13 = vector.multi_reduction <add>, %12, %cst_7 [1] : vector<8x8xf32> to vector<8xf32>
    %14 = vector.shape_cast %13 : vector<8xf32> to vector<8x1xf32>
    %15 = arith.truncf %12 : vector<8x8xf32> to vector<8x8xbf16>
    %c0_8 = arith.constant 0 : index
    %c0_9 = arith.constant 0 : index
    %c0_10 = arith.constant 0 : index
    %16 = vector.load %arg4[%c0_8, %c0_9, %c0_10] : memref<1x8x64xf32, #tpu.memory_space<vmem>>, vector<1x8x64xf32>
    %17 = vector.shape_cast %16 : vector<1x8x64xf32> to vector<8x64xf32>
    %18 = arith.truncf %17 : vector<8x64xf32> to vector<8x64xbf16>
    %cst_11 = arith.constant dense<0.000000e+00> : vector<8x64xf32>
    %19 = tpu.matmul %15, %18, %cst_11 {dimension_numbers = #tpu.dot_dimension_numbers<[1], [0], [0], [1], [0, 0, 1, 1], [], []>} : vector<8x8xbf16>, vector<8x64xbf16>, vector<8x64xf32> -> vector<8x64xf32>
    %20 = tpu.reciprocal %14 {approx = true} : vector<8x1xf32> -> vector<8x1xf32>
    %21 = vector.broadcast %20 : vector<8x1xf32> to vector<8x64xf32>
    %22 = arith.mulf %19, %21 : vector<8x64xf32>
    %c0_12 = arith.constant 0 : index
    %c0_13 = arith.constant 0 : index
    %c0_14 = arith.constant 0 : index
    %23 = vector.load %arg6[%c0_12, %c0_13, %c0_14] : memref<1x8x64xbf16, #tpu.memory_space<vmem>>, vector<1x8x64xbf16>
    %24 = vector.shape_cast %23 : vector<1x8x64xbf16> to vector<8x64xbf16>
    %25 = arith.extf %24 : vector<8x64xbf16> to vector<8x64xf32>
    %26 = arith.index_cast %arg0 : i32 to index
    %27 = memref.load %arg2[%26] : memref<4xf32, #tpu.memory_space<smem>>
    %28 = vector.broadcast %27 : f32 to vector<8x64xf32>
    %29 = arith.mulf %25, %28 : vector<8x64xf32>
    %30 = arith.addf %22, %29 : vector<8x64xf32>
    %31 = arith.truncf %30 : vector<8x64xf32> to vector<8x64xbf16>
    %c0_15 = arith.constant 0 : index
    %c0_16 = arith.constant 0 : index
    %c0_17 = arith.constant 0 : index
    %32 = vector.load %arg7[%c0_15, %c0_16, %c0_17] : memref<1x8x64xbf16, #tpu.memory_space<vmem>>, vector<1x8x64xbf16>
    %33 = vector.shape_cast %32 : vector<1x8x64xbf16> to vector<8x64xbf16>
    %34 = vector.shape_cast %31 : vector<8x64xbf16> to vector<1x8x64xbf16>
    tpu.vector_store %arg7[%c0_15, %c0_16, %c0_17], %34 {strides = array<i32>} : memref<1x8x64xbf16, #tpu.memory_space<vmem>>, vector<1x8x64xbf16>,
    return
  }
  func.func @transform_0(%arg0: i32, %arg1: i32) -> i32 {
    %c0_i32 = arith.constant 0 : i32
    %c0_i32_0 = arith.constant 0 : i32
    return %c0_i32 : i32
  }
  func.func @transform_1(%arg0: i32, %arg1: i32) -> (i32, i32, i32) {
    %c0_i32 = arith.constant 0 : i32
    %c0_i32_0 = arith.constant 0 : i32
    %c0_i32_1 = arith.constant 0 : i32
    return %arg0, %c0_i32, %c0_i32_0 : i32, i32, i32
  }
  func.func @transform_2(%arg0: i32, %arg1: i32) -> (i32, i32, i32) {
    %c0_i32 = arith.constant 0 : i32
    %c0_i32_0 = arith.constant 0 : i32
    %c0_i32_1 = arith.constant 0 : i32
    return %arg0, %c0_i32, %c0_i32_0 : i32, i32, i32
  }
  func.func @transform_3(%arg0: i32, %arg1: i32) -> (i32, i32, i32) {
    %c0_i32 = arith.constant 0 : i32
    %c0_i32_0 = arith.constant 0 : i32
    return %arg0, %arg1, %c0_i32 : i32, i32, i32
  }
  func.func @transform_4(%arg0: i32, %arg1: i32) -> (i32, i32, i32) {
    %c0_i32 = arith.constant 0 : i32
    %c0_i32_0 = arith.constant 0 : i32
    return %arg0, %arg1, %c0_i32 : i32, i32, i32
  }
  func.func @transform_5(%arg0: i32, %arg1: i32) -> (i32, i32, i32) {
    %c0_i32 = arith.constant 0 : i32
    %c0_i32_0 = arith.constant 0 : i32
    return %arg0, %arg1, %c0_i32 : i32, i32, i32
  }
}

module attributes {stable_mosaic.version = 11 : i64} {
  func.func @_out_proj_kernel(%arg0: i32, %arg1: memref<2x16x64xbf16, #tpu.memory_space<vmem>>, %arg2: memref<2x64x64xf32, #tpu.memory_space<vmem>>, %arg3: memref<1x64xf32, #tpu.memory_space<vmem>>, %arg4: memref<16x64xf32, #tpu.memory_space<vmem>>) attributes {dimension_semantics = [#tpu.dimension_semantics<parallel>], iteration_bounds = array<i64: 2>, scalar_prefetch = 0 : i64, scratch_operands = 0 : i64, tpu.core_type = #tpu.core_type<tc>, window_params = [{transform_indices = @transform_0, window_bounds = array<i64: 2, 16, 64>}, {pipeline_mode = #tpu.pipeline_mode<synchronous>, transform_indices = @transform_1, window_bounds = array<i64: 2, 64, 64>}, {pipeline_mode = #tpu.pipeline_mode<synchronous>, transform_indices = @transform_2, window_bounds = array<i64: 1, 64>}, {transform_indices = @transform_3, window_bounds = array<i64: 16, 64>}]} {
    %c0 = arith.constant 0 : index
    %c0_0 = arith.constant 0 : index
    %c0_1 = arith.constant 0 : index
    %0 = vector.load %arg2[%c0, %c0_0, %c0_1] : memref<2x64x64xf32, #tpu.memory_space<vmem>>, vector<2x64x64xf32>
    %1 = arith.truncf %0 : vector<2x64x64xf32> to vector<2x64x64xbf16>
    %cst = arith.constant 0.000000e+00 : f32
    %2 = vector.broadcast %cst : f32 to vector<16x64xf32>
    %c0_2 = arith.constant 0 : index
    %c0_3 = arith.constant 0 : index
    %c0_4 = arith.constant 0 : index
    %3 = vector.load %arg1[%c0_2, %c0_3, %c0_4] : memref<2x16x64xbf16, #tpu.memory_space<vmem>>, vector<1x16x64xbf16>
    %4 = vector.shape_cast %3 : vector<1x16x64xbf16> to vector<16x64xbf16>
    %5 = vector.extract_strided_slice %1 {offsets = [0, 0, 0], sizes = [1, 64, 64], strides = [1, 1, 1]} : vector<2x64x64xbf16> to vector<1x64x64xbf16>
    %6 = vector.shape_cast %5 : vector<1x64x64xbf16> to vector<64x64xbf16>
    %cst_5 = arith.constant dense<0.000000e+00> : vector<16x64xf32>
    %7 = tpu.matmul %4, %6, %cst_5 {dimension_numbers = #tpu.dot_dimension_numbers<[1], [0], [0], [1], [0, 0, 1, 1], [], []>} : vector<16x64xbf16>, vector<64x64xbf16>, vector<16x64xf32> -> vector<16x64xf32>
    %8 = arith.addf %2, %7 : vector<16x64xf32>
    %c1 = arith.constant 1 : index
    %c0_6 = arith.constant 0 : index
    %c0_7 = arith.constant 0 : index
    %9 = vector.load %arg1[%c1, %c0_6, %c0_7] : memref<2x16x64xbf16, #tpu.memory_space<vmem>>, vector<1x16x64xbf16>
    %10 = vector.shape_cast %9 : vector<1x16x64xbf16> to vector<16x64xbf16>
    %11 = vector.extract_strided_slice %1 {offsets = [1, 0, 0], sizes = [1, 64, 64], strides = [1, 1, 1]} : vector<2x64x64xbf16> to vector<1x64x64xbf16>
    %12 = vector.shape_cast %11 : vector<1x64x64xbf16> to vector<64x64xbf16>
    %cst_8 = arith.constant dense<0.000000e+00> : vector<16x64xf32>
    %13 = tpu.matmul %10, %12, %cst_8 {dimension_numbers = #tpu.dot_dimension_numbers<[1], [0], [0], [1], [0, 0, 1, 1], [], []>} : vector<16x64xbf16>, vector<64x64xbf16>, vector<16x64xf32> -> vector<16x64xf32>
    %14 = arith.addf %8, %13 : vector<16x64xf32>
    %c0_9 = arith.constant 0 : index
    %c0_10 = arith.constant 0 : index
    %15 = vector.load %arg3[%c0_9, %c0_10] : memref<1x64xf32, #tpu.memory_space<vmem>>, vector<1x64xf32>
    %16 = vector.broadcast %15 : vector<1x64xf32> to vector<16x64xf32>
    %17 = arith.addf %14, %16 : vector<16x64xf32>
    %c0_11 = arith.constant 0 : index
    %c0_12 = arith.constant 0 : index
    %18 = vector.load %arg4[%c0_11, %c0_12] : memref<16x64xf32, #tpu.memory_space<vmem>>, vector<16x64xf32>
    tpu.vector_store %arg4[%c0_11, %c0_12], %17 {strides = array<i32>} : memref<16x64xf32, #tpu.memory_space<vmem>>, vector<16x64xf32>,
    return
  }
  func.func @transform_0(%arg0: i32) -> (i32, i32, i32) {
    %c0_i32 = arith.constant 0 : i32
    %c0_i32_0 = arith.constant 0 : i32
    %c0_i32_1 = arith.constant 0 : i32
    return %c0_i32, %arg0, %c0_i32_0 : i32, i32, i32
  }
  func.func @transform_1(%arg0: i32) -> (i32, i32, i32) {
    %c0_i32 = arith.constant 0 : i32
    %c0_i32_0 = arith.constant 0 : i32
    %c0_i32_1 = arith.constant 0 : i32
    %c0_i32_2 = arith.constant 0 : i32
    return %c0_i32, %c0_i32_0, %c0_i32_1 : i32, i32, i32
  }
  func.func @transform_2(%arg0: i32) -> (i32, i32) {
    %c0_i32 = arith.constant 0 : i32
    %c0_i32_0 = arith.constant 0 : i32
    %c0_i32_1 = arith.constant 0 : i32
    return %c0_i32, %c0_i32_0 : i32, i32
  }
  func.func @transform_3(%arg0: i32) -> (i32, i32) {
    %c0_i32 = arith.constant 0 : i32
    %c0_i32_0 = arith.constant 0 : i32
    return %arg0, %c0_i32 : i32, i32
  }
}

</mosaic_0001>

<bundles_post_ra>
// kernel: nystrom_attention_forward.6
= control target key start
LH: loop header
LB: loop body
LE: loop exit
PB: predicated region body
PF: predicated region fallthrough
CT: control target
= control target key end

     0   :  { %7 = vsyncpa [#allocation3], 0  ;;  %s674_s9 = smov 0   ;;  %s676_s10 = smov 0   ;;  %s777_s0 = inlined_call_operand.vmem [shape: f32[32,64], index: 0, kind: input, shape index: {}]   ;;  %s778_s1 = inlined_call_operand.hbm [shape: f32[64,384], index: 1, kind: input, shape index: {}]   ;;  %s779_s2 = inlined_call_operand.vmem [shape: bf16[3,2,32,64], index: 2, kind: output, shape index: {}]  }
   0x1   :  { %s678_s11 = smov 0  }
   0x2 LB: > { %s687_s12 = sadd.s32 4294967295, %s650_s11   ;;  %s689_s13 = sadd.s32 1, %s650_s11   ;;  %s650_s11 = sphi %s678_s11, %s784_s11   ;;  %s646_s10 = sphi %s676_s10, %s783_s10   ;;  %s642_s9 = sphi %s674_s9, %s782_s9  }
   0x3   : > { %s64_s14 = ssub.s32 %s650_s11, %s689_s13  ;;  %s67_s15 = sadd.s32 1, %s646_s10 }
   0x4   : > { %p65_p0 = scmp.eq.s32.totalorder %s64_s14, 0  ;;  %p77_p1 = scmp.ne.s32.totalorder %s646_s10, %s642_s9 }
   0x5   : > { %p78_p2 = scmp.eq.s32.totalorder %s687_s12, 1  ;;  %p503_p3 = scmp.ge.s32.totalorder %s650_s11, 1 }
   0x6   : > { %s697_s16 = scalar_select %p65_p0, %s646_s10, %s67_s15  }
   0x7   : > { %p699_p4 = por %p78_p2, %p77_p1  ;;  %p91_p5 = scmp.lt.s32.totalorder %s650_s11, 3 }
   0x8   : > { %p565_p6 = scmp.eq.s32.totalorder %s687_s12, 0  ;;  %s652_s19 = smov [#allocation2]  }
   0x9   : > { %p704_p7 = pnand %p503_p3, %p91_p5  ;;  %s103_s20 = sshll.u32 %s652_s19, 4  ;;  %s104_s20 = int_to_ptr.vmem [resolvable:$true] %s103_s20 }
   0xa   : > { %s609_s21 = scalar_lea.vmem %s104_s20, 3072  ;;  %p617_p0 = scmp.lt.s32.totalorder %s104_s20, %s104_s20 }
   0xb   : > { %p561_p8 = pneg %p704_p7  ;;  %p610_p11 = scmp.ne.s32.totalorder %s104_s20, %s609_s21 }
   0xc   : > { %p618_p1 = scmp.lt.s32.totalorder %s609_s21, %s609_s21 }
   0xd   : > { %p562_p9 = pnand %p565_p6, %p561_p8 }
   0xe   : > { %p619_p2 = por %p618_p1, %p617_p0 }
   0xf   : > { %p600_p10 = pneg %p562_p9 }
  0x11   : > { %p612_p12 = pnand %p610_p11, %p600_p10 }
  0x13   : > { %p613_p13 = pneg %p612_p12 }
  0x15   : > { %p620_p3 = pnand %p619_p2, %p613_p13 }
  0x17   : > { %623 = shalt.err (!%p620_p3)
}
  0x18   : > { %s653_s22 = smov 384   ;;  %s654_s23 = smov 24  }
  0x19   : > { %564 = dma.hbm_to_vmem [thread:$0]  (!%p562_p9), %s778_s1, 3072, %s104_s20, [#allocation3], %s653_s22, %s653_s22, %s654_s23  }
  0x1a   : > { %128 = sbr.rel (%p704_p7) target bundleno = 381 (0x17d), region = 28 }
  0x1f   : > { %637 = dma.done.wait (%p565_p6), [#allocation3], 3072  }
  0x20   : > { %639 = vsyncadd (%p565_p6), [#allocation3], 4294964224  ;;  %v655_v0 = vmov 0.0   ;;  %v656_v1 = vmov 0   ;;  %vm657_vm0 = vmmov 0   ;;  %s508_s26 = sshll.u32 %s687_s12, 1 }
  0x21   : > { %544 = vmatprep.subr.bf16.mxu1 %v655_v0  ;;  %232 = vmatprep.mubr.bf16.mxu0 %v656_v1  ;;  %p150_p5 = scmp.lt.s32.totalorder %s508_s26, 3  ;;  %v179_v2 = vld [vmem:[#allocation2 + $0x98] sm:$0xff]  ;;  %v182_v3 = vld [vmem:[#allocation2 + $0xb0] sm:$0xff]  ;;  %v181_v6 = vld [vmem:[#allocation2 + $0xa8] sm:$0xff]  ;;  %vm196_vm1 = vcmask 523264   ;;  %s146_s3 = sand.u32 1, %s642_s9  }
  0x22   : > { %552 = vmatprep.mubr.msk.bf16.mxu1 %vm657_vm0, %v655_v0  ;;  %v178_v4 = vld [vmem:[#allocation2 + $0x90] sm:$0xff]  ;;  %v194_v5 = vpack.c.bf16 %v182_v3, %v179_v2  ;;  %v180_v7 = vld [vmem:[#allocation2 + $0xa0] sm:$0xff]  ;;  %v183_v8 = vld [vmem:[#allocation2 + $0xb8] sm:$0xff]  ;;  %s556_s4 = smul.u32 48, %s146_s3  ;;  %vm292_vm2 = vcmask 519168   ;;  %s658_s6 = smov 64  }
  0x23   : > { %v193_v9 = vpack.c.bf16 %v181_v6, %v178_v4  ;;  %v195_v10 = vpack.c.bf16 %v183_v8, %v180_v7  ;;  %v173_v11 = vld [vmem:[#allocation2 + $0x68] sm:$0xff]  ;;  %v176_v12 = vld [vmem:[#allocation2 + $0x80] sm:$0xff]  ;;  %s786_s26 = smov (!%p150_p5, %s508_s26), 3  ;;  %v175_v15 = vld [vmem:[#allocation2 + $0x78] sm:$0xff]  ;;  %s538_s7 = sshll.u32 (%p699_p4), %s687_s12, 3 }
  0x24   : > { %v172_v13 = vld [vmem:[#allocation2 + $0x60] sm:$0xff]  ;;  %208 = vmatprep.subr.bf16.mxu0 %v194_v5  ;;  %v191_v14 = vpack.c.bf16 %v176_v12, %v173_v11  ;;  %v174_v16 = vld [vmem:[#allocation2 + $0x70] sm:$0xff]  ;;  %v177_v17 = vld [vmem:[#allocation2 + $0x88] sm:$0xff]  ;;  %s509_s27 = sshll.u32 %s786_s26, 3  ;;  %s729_s5 = scalar_lea.vmem [#allocation4], %s556_s4 }
  0x25   : > { %209 = vmatpush1.bf16.msra.mxu0 %v193_v9  ;;  %545 = vmatpush3.bf16.msra.mxu1 %v195_v10  ;;  %v190_v18 = vpack.c.bf16 %v175_v15, %v172_v13  ;;  %v192_v19 = vpack.c.bf16 %v177_v17, %v174_v16  ;;  %v167_v20 = vld [vmem:[#allocation2 + $0x38] sm:$0xff]  ;;  %v170_v21 = vld [vmem:[#allocation2 + $0x50] sm:$0xff]  ;;  %v169_v24 = vld [vmem:[#allocation2 + $0x48] sm:$0xff]  ;;  %s153_s30 = scalar_lea.vmem %s777_s0, %s509_s27  ;;  %s353_s11 = scalar_lea.vmem (%p699_p4), %s779_s2, %s538_s7 }
  0x26   : > { %v166_v22 = vld [vmem:[#allocation2 + $0x30] sm:$0xff]  ;;  %210 = vmatprep.subr.bf16.mxu0 %v191_v14  ;;  %546 = vmatprep.subr.bf16.mxu1 %v655_v0  ;;  %v188_v23 = vpack.c.bf16 %v170_v21, %v167_v20  ;;  %v168_v25 = vld [vmem:[#allocation2 + $0x40] sm:$0xff]  ;;  %v171_v26 = vld [vmem:[#allocation2 + $0x58] sm:$0xff] }
  0x27   : > { %v161_v27 = vld [vmem:[#allocation2 + $0x8] sm:$0xff]  ;;  %v164_v28 = vld [vmem:[#allocation2 + $0x20] sm:$0xff]  ;;  %v187_v29 = vpack.c.bf16 %v169_v24, %v166_v22  ;;  %v189_v30 = vpack.c.bf16 %v171_v26, %v168_v25  ;;  %v163_v33 = vld [vmem:[#allocation2 + $0x18] sm:$0xff] }
  0x28   : > { %v160_v31 = vld [vmem:[#allocation2] sm:$0xff]  ;;  %v185_v32 = vpack.c.bf16 %v164_v28, %v161_v27  ;;  %v162_v34 = vld [vmem:[#allocation2 + $0x10] sm:$0xff]  ;;  %v165_v35 = vld [vmem:[#allocation2 + $0x28] sm:$0xff] }
  0x29   : > { %211 = vmatpush1.bf16.msra.mxu0 %v190_v18  ;;  %547 = vmatpush3.bf16.msra.mxu1 %v192_v19  ;;  %v184_v36 = vpack.c.bf16 %v163_v33, %v160_v31  ;;  %v186_v37 = vpack.c.bf16 %v165_v35, %v162_v34  ;;  %v157_v38 = vld [vmem:[%s153_s30] sm:$0xff]  ;;  %v158_v39 = vld [vmem:[%s153_s30 + $0x8] sm:$0xff] }
  0x2a   : > { %212 = vmatprep.subr.bf16.mxu0 %v188_v23  ;;  %548 = vmatprep.subr.bf16.mxu1 %v655_v0  ;;  %v159_v40 = vpack.c.bf16 %v158_v39, %v157_v38 }
  0x2d   : > { %213 = vmatpush1.bf16.msra.mxu0 %v187_v29  ;;  %549 = vmatpush3.bf16.msra.mxu1 %v189_v30 }
  0x2e   : > { %214 = vmatprep.subr.bf16.mxu0 %v185_v32  ;;  %550 = vmatprep.subr.bf16.mxu1 %v655_v0 }
  0x31   : > { %215 = vmatpush1.bf16.msra.mxu0 %v184_v36  ;;  %551 = vmatpush3.bf16.msra.mxu1 %v186_v37 }
  0x34   : > { %510 = vmatmul.mubr.msk.bf16.vlgmr.msra.gmra.mxu0 %vm196_vm1, %v159_v40  ;;  %553 = vmatmul.mubr.msk.bf16.vlgmr.msra.gmra.mxu1 %vm196_vm1, %v159_v40 }
  0xf4   : > { %v234_v41 = vpop.f32.mrf.mxu0  ;;  %v277_v42 = vpop.f32.mrf.mxu1 }
  0xf5   : > { %v532_v43 = vpack.c.bf16 %v234_v41, %v234_v41  ;;  %v536_v44 = vpack.c.bf16 %v277_v42, %v277_v42 }
  0xf6   : > { %v236_v45 = vpop.f32.mrf.mxu0  ;;  %v554_v46 = vpop.f32.mrf.mxu1 }
  0xf7   : > { %293 = vst.msk [vmem:[%s729_s5] sm:$0xf] %vm292_vm2, %v532_v43  ;;  %524 = vst.msk [vmem:[%s729_s5 + $0x20] sm:$0xf] %vm292_vm2, %v536_v44  ;;  %v534_v47 = vpack.c.bf16 %v236_v45, %v236_v45  ;;  %295 = vrot.lane.b32.xlu0 %v532_v43, %s658_s6 }
  0xf8   : > { %v238_v48 = vpop.f32.mrf.mxu0  ;;  %v280_v49 = vpop.f32.mrf.mxu1 }
  0xf9   : > { %518 = vst.msk [vmem:[%s729_s5 + $0x10] sm:$0xf] %vm292_vm2, %v534_v47  ;;  %v533_v50 = vpack.c.bf16 %v238_v48, %v238_v48  ;;  %v537_v51 = vpack.c.bf16 %v280_v49, %v280_v49  ;;  %315 = vrot.lane.b32.xlu1 %v534_v47, %s658_s6 }
  0xfa   : > { %v240_v52 = vpop.f32.mrf.mxu0  ;;  %v555_v53 = vpop.f32.mrf.mxu1 }
  0xfb   : > { %294 = vst.msk [vmem:[%s729_s5 + $0x4] sm:$0xf] %vm292_vm2, %v533_v50  ;;  %525 = vst.msk [vmem:[%s729_s5 + $0x24] sm:$0xf] %vm292_vm2, %v537_v51  ;;  %v535_v54 = vpack.c.bf16 %v240_v52, %v240_v52  ;;  %297 = vrot.lane.b32.xlu0 %v533_v50, %s658_s6 }
  0xfd   : > { %519 = vst.msk [vmem:[%s729_s5 + $0x14] sm:$0xf] %vm292_vm2, %v535_v54  ;;  %317 = vrot.lane.b32.xlu1 %v535_v54, %s658_s6 }
  0xff   : > { %335 = vrot.lane.b32.xlu0 %v536_v44, %s658_s6 }
 0x101   : > { %337 = vrot.lane.b32.xlu1 %v537_v51, %s658_s6 }
 0x102   : > { %v370_v61 = vld [vmem:[%s729_s5] sm:$0xff] (%p699_p4)  }
 0x103   : > { %v386_v1 = vld [vmem:[%s729_s5 + $0x20] sm:$0xff] (%p699_p4)   ;;  %371 = vst [vmem:[%s353_s11] sm:$0xff] (%p699_p4), %v370_v61  }
 0x104   : > { %v378_v63 = vld [vmem:[%s729_s5 + $0x10] sm:$0xff] (%p699_p4)   ;;  %387 = vst [vmem:[%s353_s11 + $0x40] sm:$0xff] (%p699_p4), %v386_v1  }
 0x105   : > { %379 = vst [vmem:[%s353_s11 + $0x20] sm:$0xff] (%p699_p4), %v378_v63  }
 0x169   : > { %v296_v55 = vpop.permute.xlu0 %295 }
 0x16a   : > { %514 = vst.msk [vmem:[%s729_s5 + $0x8] sm:$0xf] %vm292_vm2, %v296_v55 }
 0x16b   : > { %v316_v56 = vpop.permute.xlu1 %315 }
 0x16c   : > { %520 = vst.msk [vmem:[%s729_s5 + $0x18] sm:$0xf] %vm292_vm2, %v316_v56 }
 0x16d   : > { %v298_v57 = vpop.permute.xlu0 %297 }
 0x16e   : > { %515 = vst.msk [vmem:[%s729_s5 + $0xc] sm:$0xf] %vm292_vm2, %v298_v57 }
 0x16f   : > { %v318_v58 = vpop.permute.xlu1 %317 }
 0x170   : > { %521 = vst.msk [vmem:[%s729_s5 + $0x1c] sm:$0xf] %vm292_vm2, %v318_v58  ;;  %350 = sbr.rel (!%p699_p4) target bundleno = 381 (0x17d), region = 36 }
 0x171   : > { %v336_v59 = vpop.permute.xlu0 %335 }
 0x172   : > { %526 = vst.msk [vmem:[%s729_s5 + $0x28] sm:$0xf] %vm292_vm2, %v336_v59 }
 0x173   : > { %v338_v60 = vpop.permute.xlu1 %337 }
 0x174   : > { %527 = vst.msk [vmem:[%s729_s5 + $0x2c] sm:$0xf] %vm292_vm2, %v338_v60 }
 0x175   : > { %v374_v62 = vld [vmem:[%s729_s5 + $0x8] sm:$0xff]  }
 0x176   : > { %375 = vst [vmem:[%s353_s11 + $0x10] sm:$0xff] %v374_v62  }
 0x177   : > { %v382_v0 = vld [vmem:[%s729_s5 + $0x18] sm:$0xff]  }
 0x178   : > { %383 = vst [vmem:[%s353_s11 + $0x30] sm:$0xff] %v382_v0  }
 0x17b   : > { %v390_v2 = vld [vmem:[%s729_s5 + $0x28] sm:$0xff]  }
 0x17c   : > { %391 = vst [vmem:[%s353_s11 + $0x50] sm:$0xff] %v390_v2  }
 0x17d PF: > { %p10_p4 = scmp.ge.s32.totalorder %s689_s13, 4   ;;  %s782_s9 = smov %s646_s10 }
 0x17e   : > { %s783_s10 = smov %s697_s16  ;;  %s784_s11 = smov %s689_s13 }
 0x17f   :  { %12 = sbr.rel (!%p10_p4) target bundleno = 2 (0x2), region = 109 }
 0x184   :  { %451 = vsyncpa [#allocation3], 1 }
 0x185   :  { %453 = vsyncpa [#allocation3 + $0x1], 1 }

// kernel: nystrom_attention_forward.7
= control target key start
LH: loop header
LB: loop body
LE: loop exit
PB: predicated region body
PF: predicated region fallthrough
CT: control target
= control target key end

     0   :  { %s716_s15 = smov 0   ;;  %s805_s0 = inlined_call_operand.vmem [shape: bf16[32,2,64], index: 0, kind: input, shape index: {}]   ;;  %s806_s1 = inlined_call_operand.vmem [shape: bf16[32,2,64], index: 1, kind: input, shape index: {}]   ;;  %s807_s2 = inlined_call_operand.vmem [shape: f32[4,8,64], index: 2, kind: output, shape index: {0}]   ;;  %s808_s3 = inlined_call_operand.vmem [shape: f32[4,8,64], index: 3, kind: output, shape index: {1}]   ;;  %s809_s4 = inlined_call_operand.vmem [shape: f32[4,8,8], index: 4, kind: output, shape index: {2}]  }
   0x1 LB: > { %s722_s16 = sadd.s32 4294967295, %s687_s15   ;;  %p650_p0 = scmp.ge.s32.totalorder %s687_s15, 1  ;;  %s687_s15 = sphi %s716_s15, %s15_s15  }
   0x2   : > { %p177_p1 = scmp.lt.s32.totalorder %s687_s15, 5 }
   0x4   : > { %p178_p2 = pnand %p650_p0, %p177_p1 }
   0x5   : > { %s651_s17 = sshll.u32 (!%p178_p2), %s722_s16, 3  ;;  %p223_p4 = scmp.lt.s32.totalorder (!%p178_p2), %s722_s16, 3 }
   0x6   : > { %181 = sbr.rel (%p178_p2) target bundleno = 565 (0x235), region = 28  ;;  %p214_p3 = scmp.lt.s32.totalorder (!%p178_p2), %s651_s17, 31 }
   0xb   : > { %v689_v0 = vmov 0.0   ;;  %s811_s17 = smov (!%p214_p3, %s651_s17), 31  ;;  %vm690_vm0 = vmmov 0   ;;  %vm267_vm1 = vcmask 517120   ;;  %vm404_vm2 = vcmask 1041409   ;;  %s813_s16 = smov (!%p223_p4, %s722_s16), 3 }
   0xc   : > { %662 = vmatprep.subr.mxu0 %v689_v0  ;;  %664 = vmatprep.mubr.msk.f32.mxu0 %vm690_vm0, %v689_v0  ;;  %s221_s20 = scalar_lea.vmem %s806_s1, %s811_s17  ;;  %vm406_vm3 = vcmask 1042434   ;;  %vm408_vm4 = vcmask 1043459   ;;  %vm410_vm5 = vcmask 1044484   ;;  %vm412_vm6 = vcmask 1045509   ;;  %s746_s23 = scalar_lea.vmem %s805_s0, %s811_s17 }
   0xd   : > { %v251_v1 = vld [vmem:[%s221_s20] sm:$0x1]  ;;  %v252_v2 = vld [vmem:[%s221_s20 + $0x1] sm:$0x1]  ;;  %v253_v3 = vld [vmem:[%s221_s20 + $0x2] sm:$0x1] }
   0xe   : > { %v254_v4 = vld [vmem:[%s221_s20 + $0x3] sm:$0x1]  ;;  %v255_v5 = vld [vmem:[%s221_s20 + $0x4] sm:$0x1]  ;;  %v256_v6 = vld [vmem:[%s221_s20 + $0x5] sm:$0x1]  ;;  %v259_v7 = vunpack.c.l.bf16 %v251_v1  ;;  %v260_v8 = vunpack.c.l.bf16 %v252_v2  ;;  %v261_v9 = vunpack.c.l.bf16 %v253_v3 }
   0xf   : > { %v257_v10 = vld [vmem:[%s221_s20 + $0x6] sm:$0x1]  ;;  %v258_v11 = vld [vmem:[%s221_s20 + $0x7] sm:$0x1]  ;;  %v262_v12 = vunpack.c.l.bf16 %v254_v4  ;;  %v263_v13 = vunpack.c.l.bf16 %v255_v5  ;;  %v264_v14 = vunpack.c.l.bf16 %v256_v6  ;;  %vm414_vm7 = vcmask 1046534   ;;  %s758_s24 = sshll.u32 %s813_s16, 3 }
  0x10   : > { %v265_v15 = vunpack.c.l.bf16 %v257_v10  ;;  %v266_v16 = vunpack.c.l.bf16 %v258_v11  ;;  %v332_v17 = vsel %vm267_vm1, %v259_v7, 0.0  ;;  %v339_v18 = vsel %vm267_vm1, %v260_v8, 0.0  ;;  %v235_v3 = vld [vmem:[%s746_s23] sm:$0x1]  ;;  %v236_v4 = vld [vmem:[%s746_s23 + $0x1] sm:$0x1]  ;;  %s230_s27 = scalar_lea.vmem %s808_s3, %s758_s24  ;;  %s226_s30 = scalar_lea.vmem %s807_s2, %s758_s24 }
  0x11   : > { %v333_v19 = vrot.slane %v332_v17, 4  ;;  %v340_v20 = vrot.slane %v339_v18, 4  ;;  %v346_v21 = vsel %vm267_vm1, %v261_v9, 0.0  ;;  %v353_v22 = vsel %vm267_vm1, %v262_v12, 0.0  ;;  %v237_v9 = vld [vmem:[%s746_s23 + $0x2] sm:$0x1]  ;;  %s234_s7 = scalar_lea.vmem %s809_s4, %s758_s24 }
  0x12   : > { %v347_v23 = vrot.slane %v346_v21, 4  ;;  %v354_v24 = vrot.slane %v353_v22, 4  ;;  %v360_v25 = vsel %vm267_vm1, %v263_v13, 0.0  ;;  %v367_v26 = vsel %vm267_vm1, %v264_v14, 0.0  ;;  %v238_v10 = vld [vmem:[%s746_s23 + $0x3] sm:$0x1] }
  0x13   : > { %v334_v27 = vadd.f32 %v333_v19, %v332_v17  ;;  %v341_v28 = vadd.f32 %v340_v20, %v339_v18  ;;  %v361_v29 = vrot.slane %v360_v25, 4  ;;  %v368_v30 = vrot.slane %v367_v26, 4  ;;  %v240_v19 = vld [vmem:[%s746_s23 + $0x5] sm:$0x1] }
  0x14   : > { %v348_v31 = vadd.f32 %v347_v23, %v346_v21  ;;  %v355_v32 = vadd.f32 %v354_v24, %v353_v22  ;;  %v374_v33 = vsel %vm267_vm1, %v265_v15, 0.0  ;;  %v381_v34 = vsel %vm267_vm1, %v266_v16, 0.0  ;;  %v239_v15 = vld [vmem:[%s746_s23 + $0x4] sm:$0x1]  ;;  %v241_v24 = vld [vmem:[%s746_s23 + $0x6] sm:$0x1] }
  0x15   : > { %v335_v35 = vrot.slane %v334_v27, 2  ;;  %v342_v36 = vrot.slane %v341_v28, 2  ;;  %v362_v37 = vadd.f32 %v361_v29, %v360_v25  ;;  %v369_v38 = vadd.f32 %v368_v30, %v367_v26  ;;  %v242_v25 = vld [vmem:[%s746_s23 + $0x7] sm:$0x1] }
  0x16   : > { %v349_v39 = vrot.slane %v348_v31, 2  ;;  %v356_v40 = vrot.slane %v355_v32, 2  ;;  %v375_v41 = vrot.slane %v374_v33, 4  ;;  %v382_v42 = vrot.slane %v381_v34, 4 }
  0x17   : > { %v336_v43 = vadd.f32 %v335_v35, %v334_v27  ;;  %v343_v44 = vadd.f32 %v342_v36, %v341_v28  ;;  %v363_v45 = vrot.slane %v362_v37, 2  ;;  %v370_v46 = vrot.slane %v369_v38, 2 }
  0x18   : > { %v350_v47 = vadd.f32 %v349_v39, %v348_v31  ;;  %v357_v48 = vadd.f32 %v356_v40, %v355_v32  ;;  %v376_v49 = vadd.f32 %v375_v41, %v374_v33  ;;  %v383_v50 = vadd.f32 %v382_v42, %v381_v34 }
  0x19   : > { %v337_v51 = vrot.slane %v336_v43, 1  ;;  %v344_v52 = vrot.slane %v343_v44, 1  ;;  %v364_v53 = vadd.f32 %v363_v45, %v362_v37  ;;  %v371_v54 = vadd.f32 %v370_v46, %v369_v38 }
  0x1a   : > { %v351_v55 = vrot.slane %v350_v47, 1  ;;  %v358_v56 = vrot.slane %v357_v48, 1  ;;  %v377_v57 = vrot.slane %v376_v49, 2  ;;  %v384_v58 = vrot.slane %v383_v50, 2 }
  0x1b   : > { %vm416_vm8 = vcmask 1047559   ;;  %v338_v59 = vadd.f32 %v337_v51, %v336_v43  ;;  %v345_v60 = vadd.f32 %v344_v52, %v343_v44  ;;  %v365_v61 = vrot.slane %v364_v53, 1 }
  0x1c   : > { %v372_v62 = vrot.slane %v371_v54, 1  ;;  %vm419_vm9 = vcmask 523264   ;;  %v352_v63 = vadd.f32 %v351_v55, %v350_v47  ;;  %v359_v0 = vadd.f32 %v358_v56, %v357_v48 }
  0x1d   : > { %v378_v1 = vadd.f32 %v377_v57, %v376_v49  ;;  %v385_v2 = vadd.f32 %v384_v58, %v383_v50  ;;  %v366_v5 = vadd.f32 %v365_v61, %v364_v53  ;;  %v388_v7 = vmul.f32 0.5, %v338_v59 }
  0x1e   : > { %v373_v6 = vadd.f32 %v372_v62, %v371_v54  ;;  %v389_v8 = vmul.f32 0.5, %v345_v60  ;;  %v390_v13 = vmul.f32 0.5, %v352_v63  ;;  %v391_v14 = vmul.f32 0.5, %v359_v0 }
  0x1f   : > { %v379_v11 = vrot.slane %v378_v1, 1  ;;  %v386_v12 = vrot.slane %v385_v2, 1  ;;  %v392_v16 = vmul.f32 0.5, %v366_v5  ;;  %v243_v20 = vunpack.c.l.bf16 %v235_v3 }
  0x20   : > { %v393_v17 = vmul.f32 0.5, %v373_v6  ;;  %v429_v18 = vsel %vm404_vm2, %v389_v8, %v388_v7  ;;  %v244_v26 = vunpack.c.l.bf16 %v236_v4  ;;  %v245_v28 = vunpack.c.l.bf16 %v237_v9 }
  0x21   : > { %v380_v21 = vadd.f32 %v379_v11, %v378_v1  ;;  %v387_v22 = vadd.f32 %v386_v12, %v385_v2  ;;  %v430_v23 = vsel %vm406_vm3, %v390_v13, %v429_v18  ;;  %v246_v29 = vunpack.c.l.bf16 %v238_v10 }
  0x22   : > { %v431_v27 = vsel %vm408_vm4, %v391_v14, %v430_v23  ;;  %v247_v30 = vunpack.c.l.bf16 %v239_v15  ;;  %v248_v34 = vunpack.c.l.bf16 %v240_v19  ;;  %v249_v36 = vunpack.c.l.bf16 %v241_v24 }
  0x23   : > { %v394_v31 = vmul.f32 0.5, %v380_v21  ;;  %v395_v32 = vmul.f32 0.5, %v387_v22  ;;  %v432_v33 = vsel %vm410_vm5, %v392_v16, %v431_v27  ;;  %v250_v37 = vunpack.c.l.bf16 %v242_v25 }
  0x24   : > { %v433_v35 = vsel %vm412_vm6, %v393_v17, %v432_v33  ;;  %v268_v38 = vsel %vm267_vm1, %v243_v20, 0.0  ;;  %v275_v41 = vsel %vm267_vm1, %v244_v26, 0.0  ;;  %v282_v42 = vsel %vm267_vm1, %v245_v28, 0.0 }
  0x25   : > { %v434_v39 = vsel %vm414_vm7, %v394_v31, %v433_v35  ;;  %v269_v40 = vrot.slane %v268_v38, 4  ;;  %v276_v44 = vrot.slane %v275_v41, 4  ;;  %v283_v45 = vrot.slane %v282_v42, 4 }
  0x26   : > { %v435_v43 = vsel %vm416_vm8, %v395_v32, %v434_v39  ;;  %v289_v46 = vsel %vm267_vm1, %v246_v29, 0.0  ;;  %v296_v49 = vsel %vm267_vm1, %v247_v30, 0.0  ;;  %v303_v50 = vsel %vm267_vm1, %v248_v34, 0.0 }
  0x27   : > { %437 = vst.msk [vmem:[%s230_s27] sm:$0xff] %vm419_vm9, %v435_v43  ;;  %663 = vmatpush3.xpose.msk.msra.mxu0 %vm419_vm9, %v435_v43  ;;  %v270_v47 = vadd.f32 %v269_v40, %v268_v38  ;;  %v290_v48 = vrot.slane %v289_v46, 4  ;;  %v277_v51 = vadd.f32 %v276_v44, %v275_v41  ;;  %v284_v52 = vadd.f32 %v283_v45, %v282_v42 }
  0x28   : > { %v297_v53 = vrot.slane %v296_v49, 4  ;;  %v304_v54 = vrot.slane %v303_v50, 4  ;;  %v310_v57 = vsel %vm267_vm1, %v249_v36, 0.0  ;;  %v317_v58 = vsel %vm267_vm1, %v250_v37, 0.0 }
  0x29   : > { %v271_v55 = vrot.slane %v270_v47, 2  ;;  %v291_v56 = vadd.f32 %v290_v48, %v289_v46  ;;  %v278_v59 = vrot.slane %v277_v51, 2  ;;  %v285_v60 = vrot.slane %v284_v52, 2 }
  0x2a   : > { %v298_v61 = vadd.f32 %v297_v53, %v296_v49  ;;  %v305_v62 = vadd.f32 %v304_v54, %v303_v50  ;;  %v311_v1 = vrot.slane %v310_v57, 4  ;;  %v318_v2 = vrot.slane %v317_v58, 4 }
  0x2b   : > { %v272_v63 = vadd.f32 %v271_v55, %v270_v47  ;;  %v292_v0 = vrot.slane %v291_v56, 2  ;;  %v279_v3 = vadd.f32 %v278_v59, %v277_v51  ;;  %v286_v4 = vadd.f32 %v285_v60, %v284_v52 }
  0x2c   : > { %v299_v5 = vrot.slane %v298_v61, 2  ;;  %v306_v6 = vrot.slane %v305_v62, 2  ;;  %v312_v9 = vadd.f32 %v311_v1, %v310_v57  ;;  %v319_v10 = vadd.f32 %v318_v2, %v317_v58 }
  0x2d   : > { %v273_v7 = vrot.slane %v272_v63, 1  ;;  %v293_v8 = vadd.f32 %v292_v0, %v291_v56  ;;  %v280_v11 = vrot.slane %v279_v3, 1  ;;  %v287_v12 = vrot.slane %v286_v4, 1 }
  0x2e   : > { %v300_v13 = vadd.f32 %v299_v5, %v298_v61  ;;  %v307_v14 = vadd.f32 %v306_v6, %v305_v62  ;;  %v313_v17 = vrot.slane %v312_v9, 2  ;;  %v320_v18 = vrot.slane %v319_v10, 2 }
  0x2f   : > { %v274_v15 = vadd.f32 %v273_v7, %v272_v63  ;;  %v294_v16 = vrot.slane %v293_v8, 1  ;;  %v281_v19 = vadd.f32 %v280_v11, %v279_v3  ;;  %v288_v20 = vadd.f32 %v287_v12, %v286_v4 }
  0x30   : > { %v301_v21 = vrot.slane %v300_v13, 1  ;;  %v308_v22 = vrot.slane %v307_v14, 1  ;;  %v314_v24 = vadd.f32 %v313_v17, %v312_v9  ;;  %v321_v25 = vadd.f32 %v320_v18, %v319_v10 }
  0x31   : > { %v295_v23 = vadd.f32 %v294_v16, %v293_v8  ;;  %v324_v26 = vmul.f32 0.0625, %v274_v15  ;;  %v325_v29 = vmul.f32 0.0625, %v281_v19  ;;  %v326_v30 = vmul.f32 0.0625, %v288_v20 }
  0x32   : > { %v302_v27 = vadd.f32 %v301_v21, %v300_v13  ;;  %v309_v28 = vadd.f32 %v308_v22, %v307_v14  ;;  %v315_v31 = vrot.slane %v314_v24, 1  ;;  %v322_v32 = vrot.slane %v321_v25, 1 }
  0x33   : > { %v327_v33 = vmul.f32 0.0625, %v295_v23  ;;  %v405_v36 = vsel %vm404_vm2, %v325_v29, %v324_v26  ;;  %vm512_vm10 = vcmask 64512  }
  0x34   : > { %v328_v34 = vmul.f32 0.0625, %v302_v27  ;;  %v329_v35 = vmul.f32 0.0625, %v309_v28  ;;  %v316_v37 = vadd.f32 %v315_v31, %v314_v24  ;;  %v323_v38 = vadd.f32 %v322_v32, %v321_v25 }
  0x35   : > { %v407_v39 = vsel %vm406_vm3, %v326_v30, %v405_v36 }
  0x36   : > { %v409_v40 = vsel %vm408_vm4, %v327_v33, %v407_v39  ;;  %v330_v41 = vmul.f32 0.0625, %v316_v37  ;;  %v331_v42 = vmul.f32 0.0625, %v323_v38 }
  0x37   : > { %v411_v43 = vsel %vm410_vm5, %v328_v34, %v409_v40 }
  0x38   : > { %v413_v44 = vsel %vm412_vm6, %v329_v35, %v411_v43 }
  0x39   : > { %v415_v45 = vsel %vm414_vm7, %v330_v41, %v413_v44 }
  0x3a   : > { %v417_v46 = vsel %vm416_vm8, %v331_v42, %v415_v45 }
  0x3b   : > { %420 = vst.msk [vmem:[%s226_s30] sm:$0xff] %vm419_vm9, %v417_v46  ;;  %665 = vmatmul.mubr.msk.f32.vlgmr.msra.gmra.mxu0 %vm419_vm9, %v417_v46 }
  0xfb   : > { %v508_v47 = vpop.f32.mrf.mxu0 }
  0xfc   : > { %v513_v48 = vsel %vm512_vm10, %v508_v47, -inf }
  0xfd   : > { %514 = vmax.xlane.f32.xlu0 %v513_v48  ;;  %v666_v49 = vpop.f32.mrf.mxu0 }
 0x186   : > { %v515_v50 = vpop.xlane.xlu0 %514 }
 0x187   : > { %v516_v51 = vsub.f32 %v508_v47, %v515_v50 }
 0x189   : > { %v517_v52 = vmul.f32 1.442695, %v516_v51 }
 0x18b   : > { %677 = vpow2.f32 %v517_v52 }
 0x198   : > { %v678_v53 = vpop.eup %677 }
 0x199   : > { %v519_v54 = vsel %vm512_vm10, %v678_v53, 0.0 }
 0x19a   : > { %520 = vadd.xlane.f32.xlu0 %v519_v54 }
 0x223   : > { %v521_v55 = vpop.xlane.xlu0 %520 }
 0x224   : > { %679 = vrcp.f32 %v521_v55 }
 0x231   : > { %v680_v56 = vpop.eup %679 }
 0x232   : > { %v523_v57 = vmul.f32 %v680_v56, %v678_v53 }
 0x234   : > { %524 = vst.msk [vmem:[%s234_s7] sm:$0xff] %vm512_vm10, %v523_v57 }
 0x235 PF: > { %s15_s15 = sadd.s32 1, %s687_s15  }
 0x236   : > { %p12_p5 = scmp.ge.s32.totalorder %s15_s15, 6  }
 0x238   :  { %14 = sbr.rel (!%p12_p5) target bundleno = 1 (0x1), region = 85 }

// kernel: nystrom_attention_forward.9
= control target key start
LH: loop header
LB: loop body
LE: loop exit
PB: predicated region body
PF: predicated region fallthrough
CT: control target
= control target key end

     0   :  { %s800_s15 = smov 0   ;;  %s802_s16 = smov 0   ;;  %s894_s0 = inlined_call_operand.vmem [shape: f32[4,8,64], index: 0, kind: input, shape index: {}]   ;;  %s895_s1 = inlined_call_operand.vmem [shape: f32[4,8,8], index: 1, kind: input, shape index: {}]   ;;  %s896_s2 = inlined_call_operand.vmem [shape: bf16[4,16,64], index: 2, kind: input, shape index: {}]   ;;  %s897_s3 = inlined_call_operand.vmem [shape: bf16[4,16,64], index: 3, kind: input, shape index: {}]   ;;  %s898_s4 = inlined_call_operand.vmem [shape: f32[4,8,64], index: 4, kind: output, shape index: {}]  }
   0x1   :  { %s804_s17 = smov 0   ;;  %s806_s18 = smov 0  }
   0x2   :  { %s808_s19 = smov 0  }
   0x3 LB: > { %s23_s20 = sadd.s32 1, %s757_s17  ;;  %s26_s21 = sadd.s32 1, %s761_s18  ;;  %s765_s19 = sphi %s808_s19, %s14_s19   ;;  %s761_s18 = sphi %s806_s18, %s902_s18   ;;  %s757_s17 = sphi %s804_s17, %s901_s17   ;;  %s753_s16 = sphi %s802_s16, %s900_s16   ;;  %s749_s15 = sphi %s800_s15, %s899_s15  }
   0x4   : > { %p24_p0 = scmp.ge.s32.totalorder %s23_s20, 2  ;;  %p632_p1 = scmp.ge.s32.totalorder %s765_s19, 1 }
   0x5   : > { %p212_p2 = scmp.lt.s32.totalorder %s765_s19, 9 }
   0x6   : > { %s904_s20 = smov (%p24_p0, %s23_s20), 0  ;;  %s906_s21 = smov (!%p24_p0, %s26_s21), %s761_s18 }
   0x7   : > { %p213_p3 = pnand %p632_p1, %p212_p2  ;;  %p28_p4 = scmp.ge.s32.totalorder %s906_s21, 4 }
   0x8   : > { %p256_p5 = scmp.lt.s32.totalorder (!%p213_p3), %s753_s16, 3  ;;  %p266_p6 = scmp.lt.s32.totalorder (!%p213_p3), %s749_s15, 1 }
   0x9   : > { %s908_s21 = smov (%p28_p4, %s906_s21), 0  ;;  %216 = sbr.rel (%p213_p3) target bundleno = 1051 (0x41b), region = 36 }
   0xa   : > { %p640_p7 = scmp.ne.s32.totalorder (!%p213_p3), %s749_s15, 0 }
   0xe   : > { %s910_s16 = smov (!%p256_p5, %s753_s16), 3 }
   0xf   : > { %s267_s22 = scalar_select %p266_p6, %s749_s15, 1 }
  0x10   : > { %s834_s23 = sshll.u32 %s910_s16, 3  ;;  %s635_s24 = sshll.u32 %s910_s16, 1 }
  0x11   : > { %s259_s27 = scalar_lea.vmem %s894_s0, %s834_s23  ;;  %s263_s30 = scalar_lea.vmem %s895_s1, %s834_s23 }
  0x12   : > { %s269_s5 = sadd.s32 %s635_s24, %s267_s22  ;;  %s283_s8 = scalar_lea.vmem %s898_s4, %s834_s23 }
  0x13   : > { %s636_s9 = sshll.u32 %s269_s5, 2  ;;  %288 = sbr.rel (%p640_p7) target bundleno = 27 (0x1b), region = 40 }
  0x14   : > { %s271_s12 = scalar_lea.vmem %s896_s2, %s636_s9  ;;  %s854_s16 = scalar_lea.vmem %s897_s3, %s636_s9 }
  0x18   : > { %vm289_vm0 = vcmask 7168   ;;  %vm292_vm1 = vcmask 523264   ;;  %v767_v0 = vmov -inf   ;;  %v768_v1 = vmov 0.0  }
  0x19   : > { %290 = vst.msk [vmem:[#allocation2] sm:$0xff] %vm289_vm0, %v767_v0  ;;  %291 = vst.msk [vmem:[#allocation3] sm:$0xff] %vm289_vm0, %v768_v1 }
  0x1a   : > { %293 = vst.msk [vmem:[#allocation4] sm:$0xff] %vm292_vm1, %v768_v1 }
  0x1b PF: > { %v296_v2 = vld [vmem:[%s271_s12] sm:$0xf]  ;;  %vm297_vm2 = vcmask 523264   ;;  %v769_v3 = vmov 0.0   ;;  %vm770_vm3 = vmmov 0   ;;  %vm345_vm4 = vcmask 64512  }
  0x1c   : > { %653 = vmatprep.subr.bf16.mxu0 %v769_v3  ;;  %v302_v4 = vsel %vm297_vm2, %v296_v2, 0  ;;  %655 = vmatprep.mubr.msk.bf16.mxu0 %vm770_vm3, %v769_v3  ;;  %v294_v5 = vld [vmem:[%s259_s27] sm:$0xff]  ;;  %v771_v12 = vmov 0   ;;  %vm367_vm5 = vcmask 7168   ;;  %vm381_vm6 = vcmask 1043456   ;;  %p643_p8 = scmp.ne.s32.totalorder %s749_s15, 1 }
  0x1d   : > { %654 = vmatpush3.bf16.xpose.msra.mxu0 %v302_v4  ;;  %659 = vmatprep.subr.bf16.mxu1 %v769_v3  ;;  %v295_v6 = vpack.c.bf16 %v294_v5, %v294_v5  ;;  %v377_v17 = vld [vmem:[%s854_s16] sm:$0xf] }
  0x1e   : > { %661 = vmatprep.mubr.msk.bf16.mxu1 %vm770_vm3, %v769_v3  ;;  %718 = vset.pattern.permute.xlu0 %v771_v12  ;;  %v383_v18 = vsel %vm381_vm6, %v377_v17, 0 }
  0x1f   : > { %719 = vset.pattern.permute.xlu1 %v771_v12  ;;  %660 = vmatpush3.bf16.msra.mxu1 %v383_v18 }
  0x20   : > { %v344_v13 = vld [vmem:[#allocation2] sm:$0xff]  ;;  %v361_v27 = vld [vmem:[#allocation3] sm:$0xff] }
  0x21   : > { %v369_v31 = vld [vmem:[#allocation4] sm:$0xff] }
  0x24   : > { %656 = vmatmul.mubr.msk.bf16.vlgmr.msra.gmra.mxu0 %vm297_vm2, %v295_v6 }
  0xe4   : > { %v338_v7 = vpop.f32.mrf.mxu0 }
  0xe5   : > { %v346_v8 = vsel %vm345_vm4, %v338_v7, -inf }
  0xe6   : > { %347 = vmax.xlane.f32.xlu0 %v346_v8  ;;  %v657_v9 = vpop.f32.mrf.mxu0 }
  0xe8   : > { %v341_v10 = vpop.f32.mrf.mxu0 }
  0xea   : > { %v658_v11 = vpop.f32.mrf.mxu0 }
 0x16f   : > { %v348_v14 = vpop.xlane.xlu0 %347 }
 0x170   : > { %v349_v15 = vmax.f32 %v344_v13, %v348_v14 }
 0x172   : > { %v350_v16 = vsub.f32 %v344_v13, %v349_v15  ;;  %427 = vst.msk [vmem:[#allocation2] sm:$0xff] %vm367_vm5, %v349_v15  ;;  %355 = vperm.xlu0 %718, %v349_v15  }
 0x174   : > { %v351_v23 = vmul.f32 1.442695, %v350_v16 }
 0x1ed   : > { %v356_v19 = vpop.permute.xlu0 %355 }
 0x1ee   : > { %v358_v20 = vsub.f32 %v338_v7, %v356_v19 }
 0x1f0   : > { %v359_v21 = vmul.f32 1.442695, %v358_v20 }
 0x1f2   : > { %720 = vpow2.f32 %v359_v21 }
 0x1f3   : > { %722 = vpow2.f32 %v351_v23 }
 0x1ff   : > { %v721_v22 = vpop.eup %720 }
 0x200   : > { %v363_v24 = vsel %vm345_vm4, %v721_v22, 0.0  ;;  %v376_v25 = vpack.c.bf16 %v721_v22, %v721_v22  ;;  %v723_v26 = vpop.eup %722 }
 0x201   : > { %364 = vadd.xlane.f32.xlu1 %v363_v24  ;;  %v362_v28 = vmul.f32 %v723_v26, %v361_v27 }
 0x202   : > { %662 = vmatmul.mubr.msk.bf16.vlgmr.msra.gmra.mxu1 %vm345_vm4, %v376_v25 }
 0x212   : > { %372 = vperm.xlu1 %719, %v723_v26  }
 0x28a   : > { %v365_v29 = vpop.xlane.xlu1 %364 }
 0x28b   : > { %v366_v30 = vadd.f32 %v365_v29, %v362_v28 }
 0x28d   : > { %368 = vst.msk [vmem:[#allocation3] sm:$0xff] %vm367_vm5, %v366_v30 }
 0x28e   : > { %v373_v32 = vpop.permute.xlu1 %372 }
 0x28f   : > { %v375_v33 = vmul.f32 %v373_v32, %v369_v31 }
 0x2c2   : > { %v419_v34 = vpop.f32.mrf.mxu1 }
 0x2c3   : > { %v425_v35 = vadd.f32 %v419_v34, %v375_v33 }
 0x2c4   : > { %v663_v36 = vpop.f32.mrf.mxu1  ;;  %431 = sbr.rel (%p643_p8) target bundleno = 1051 (0x41b), region = 44 }
 0x2c5   : > { %426 = vst.msk [vmem:[#allocation4] sm:$0xff] %vm297_vm2, %v425_v35 }
 0x2c6   : > { %v422_v37 = vpop.f32.mrf.mxu1 }
 0x2c8   : > { %v664_v38 = vpop.f32.mrf.mxu1 }
 0x2c9   : > { %v433_v39 = vld [vmem:[#allocation3] sm:$0xff]  ;;  %v772_v40 = vmov 0   ;;  %v773_v41 = vmov 0.0   ;;  %vm774_vm7 = vmmov 0   ;;  %v441_v46 = vld [vmem:[%s263_s30] sm:$0xff] }
 0x2ca   : > { %724 = vset.pattern.permute.xlu0 %v772_v40  ;;  %665 = vmatprep.subr.mxu0 %v773_v41 }
 0x2cb   : > { %436 = vperm.xlu0 %724, %v433_v39   ;;  %667 = vmatprep.mubr.msk.f32.mxu0 %vm774_vm7, %v773_v41 }
 0x2cc   : > { %v432_v43 = vld [vmem:[#allocation4] sm:$0xff] }
 0x346   : > { %v437_v42 = vpop.permute.xlu0 %436 }
 0x347   : > { %725 = vrcp.f32 %v437_v42 }
 0x354   : > { %v726_v44 = vpop.eup %725 }
 0x355   : > { %v440_v45 = vmul.f32 %v726_v44, %v432_v43 }
 0x357   : > { %666 = vmatpush3.msra.mxu0 %v440_v45 }
 0x358   : > { %668 = vmatmul.mubr.msk.f32.vlgmr.msra.gmra.mxu0 %vm345_vm4, %v441_v46 }
 0x418   : > { %v511_v47 = vpop.f32.mrf.mxu0 }
 0x419   : > { %515 = vst.msk [vmem:[%s283_s8] sm:$0xff] %vm297_vm2, %v511_v47 }
 0x41a   : > { %v669_v48 = vpop.f32.mrf.mxu0 }
 0x41b PF: > { %s14_s19 = sadd.s32 1, %s765_s19   ;;  %s899_s15 = smov %s757_s17 }
 0x41c   : > { %p11_p9 = scmp.ge.s32.totalorder %s14_s19, 10   ;;  %s900_s16 = smov %s761_s18 }
 0x41d   : > { %s901_s17 = smov %s904_s20  ;;  %s902_s18 = smov %s908_s21 }
 0x41e   :  { %13 = sbr.rel (!%p11_p9) target bundleno = 3 (0x3), region = 83 }

// kernel: nystrom_attention_forward.8
= control target key start
LH: loop header
LB: loop body
LE: loop exit
PB: predicated region body
PF: predicated region fallthrough
CT: control target
= control target key end

     0   :  { %s2224_s11 = smov 0   ;;  %s2379_s0 = inlined_call_operand.<no memory space> [shape: f32[1,1], index: 0, kind: input, shape index: {}]   ;;  %s2380_s1 = inlined_call_operand.vmem [shape: f32[4,8,8], index: 1, kind: input, shape index: {}]   ;;  %s2381_s2 = inlined_call_operand.vmem [shape: f32[4,8,8], index: 2, kind: output, shape index: {}]  }
   0x1   :  { %7 = sst [smem:[#allocation2]] %s2379_s0 }
   0x2 LB: > { %s1984_s12 = sadd.s32 4294967295, %s2202_s11   ;;  %p1988_p0 = scmp.ge.s32.totalorder %s2202_s11, 1  ;;  %s2202_s11 = sphi %s2224_s11, %s13_s11  }
   0x3   : > { %p112_p1 = scmp.lt.s32.totalorder %s2202_s11, 5 }
   0x5   : > { %p113_p2 = pnand %p1988_p0, %p112_p1 }
   0x6   : > { %p132_p3 = scmp.lt.s32.totalorder (!%p113_p2), %s1984_s12, 3  ;;  %s180_s16 = sld [smem:[#allocation2]] (!%p113_p2) }
   0x7   : > { %116 = sbr.rel (%p113_p2) target bundleno = 4848 (0x12f0), region = 28 }
   0xc   : > { %s2383_s12 = smov (!%p132_p3, %s1984_s12), 3  ;;  %v2204_v0 = vmov 0.0   ;;  %vm2205_vm0 = vmmov 0   ;;  %v181_v2 = vstv %s180_s16  ;;  %vm183_vm1 = vcmask 64512  }
   0xd   : > { %s1989_s0 = sshll.u32 %s2383_s12, 3  ;;  %2066 = vmatprep.subr.mxu0 %v2204_v0  ;;  %2071 = vmatprep.subr.mxu1 %v2204_v0  ;;  %v141_v5 = vlaneseq }
   0xe   : > { %s135_s15 = scalar_lea.vmem %s2380_s1, %s1989_s0  ;;  %2068 = vmatprep.mubr.msk.f32.mxu0 %vm2205_vm0, %v2204_v0  ;;  %2073 = vmatprep.mubr.msk.f32.mxu1 %vm2205_vm0, %v2204_v0  ;;  %s139_s19 = scalar_lea.vmem %s2381_s2, %s1989_s0 }
   0xf   : > { %v2242_v1 = vld [vmem:[%s135_s15] sm:$0xff]  ;;  %v142_v6 = vshrl.u32 %v141_v5, 7  ;;  %v144_v7 = vand.u32 127, %v141_v5 }
  0x10   : > { %148 = vxpose.xlu0.b32.start.end [1/1] (short) (narrow) %v2242_v1, 8 }
  0x11   : > { %vm145_vm2 = vcmp.eq.s32.totalorder %v142_v6, %v144_v7 }
  0x12   : > { %v1991_v8 = vsel %vm145_vm2, 1.0, %v2204_v0 }
  0x13   : > { %v2255_v9 = vmul.f32 7.0, %v1991_v8  ;;  %v2262_v13 = vmul.f32 15.0, %v1991_v8  ;;  %v2269_v17 = vmul.f32 13.0, %v1991_v8 }
  0x8c   : > { %v164_v3 = vpop.trf.xlu0 }
  0x8d   : > { %v182_v4 = vmul.f32 %v181_v2, %v164_v3 }
  0x8f   : > { %2067 = vmatpush3.msra.mxu0 %v182_v4 }
  0x90   : > { %2069 = vmatmul.mubr.msk.f32.vlgmr.msra.gmra.mxu0 %vm183_vm1, %v2242_v1  ;;  %2076 = vmatprep.subr.mxu0 %v2204_v0 }
  0x91   : > { %2078 = vmatprep.mubr.msk.f32.mxu0 %vm2205_vm0, %v2204_v0 }
 0x150   : > { %v253_v10 = vpop.f32.mrf.mxu0 }
 0x151   : > { %v258_v11 = vsub.f32 %v2255_v9, %v253_v10 }
 0x152   : > { %v2070_v12 = vpop.f32.mrf.mxu0 }
 0x153   : > { %2072 = vmatpush3.msra.mxu1 %v258_v11 }
 0x154   : > { %2074 = vmatmul.mubr.msk.f32.vlgmr.msra.gmra.mxu1 %vm183_vm1, %v253_v10  ;;  %2081 = vmatprep.subr.mxu1 %v2204_v0 }
 0x155   : > { %2083 = vmatprep.mubr.msk.f32.mxu1 %vm2205_vm0, %v2204_v0 }
 0x214   : > { %v329_v14 = vpop.f32.mrf.mxu1 }
 0x215   : > { %v333_v15 = vsub.f32 %v2262_v13, %v329_v14 }
 0x216   : > { %v2075_v16 = vpop.f32.mrf.mxu1 }
 0x217   : > { %2077 = vmatpush3.msra.mxu0 %v333_v15 }
 0x218   : > { %2079 = vmatmul.mubr.msk.f32.vlgmr.msra.gmra.mxu0 %vm183_vm1, %v253_v10  ;;  %2086 = vmatprep.subr.mxu0 %v2204_v0 }
 0x219   : > { %2088 = vmatprep.mubr.msk.f32.mxu0 %vm2205_vm0, %v2204_v0 }
 0x2d8   : > { %v401_v18 = vpop.f32.mrf.mxu0 }
 0x2d9   : > { %v405_v19 = vsub.f32 %v2269_v17, %v401_v18 }
 0x2da   : > { %v2080_v20 = vpop.f32.mrf.mxu0 }
 0x2db   : > { %2082 = vmatpush3.msra.mxu1 %v405_v19 }
 0x2dc   : > { %2084 = vmatmul.mubr.msk.f32.vlgmr.msra.gmra.mxu1 %vm183_vm1, %v182_v4  ;;  %2091 = vmatprep.subr.mxu1 %v2204_v0 }
 0x2dd   : > { %2093 = vmatprep.mubr.msk.f32.mxu1 %vm2205_vm0, %v2204_v0 }
 0x39c   : > { %v475_v21 = vpop.f32.mrf.mxu1 }
 0x39d   : > { %v479_v22 = vmul.f32 0.25, %v475_v21 }
 0x39e   : > { %v2085_v23 = vpop.f32.mrf.mxu1 }
 0x39f   : > { %2087 = vmatpush3.msra.mxu0 %v479_v22 }
 0x3a0   : > { %2089 = vmatmul.mubr.msk.f32.vlgmr.msra.gmra.mxu0 %vm183_vm1, %v2242_v1  ;;  %2096 = vmatprep.subr.mxu0 %v2204_v0 }
 0x3a1   : > { %2098 = vmatprep.mubr.msk.f32.mxu0 %vm2205_vm0, %v2204_v0 }
 0x460   : > { %v546_v24 = vpop.f32.mrf.mxu0 }
 0x461   : > { %v550_v25 = vsub.f32 %v2255_v9, %v546_v24 }
 0x462   : > { %v2090_v26 = vpop.f32.mrf.mxu0 }
 0x463   : > { %2092 = vmatpush3.msra.mxu1 %v550_v25 }
 0x464   : > { %2094 = vmatmul.mubr.msk.f32.vlgmr.msra.gmra.mxu1 %vm183_vm1, %v546_v24  ;;  %2101 = vmatprep.subr.mxu1 %v2204_v0 }
 0x465   : > { %2103 = vmatprep.mubr.msk.f32.mxu1 %vm2205_vm0, %v2204_v0 }
 0x524   : > { %v620_v27 = vpop.f32.mrf.mxu1 }
 0x525   : > { %v624_v28 = vsub.f32 %v2262_v13, %v620_v27 }
 0x526   : > { %v2095_v29 = vpop.f32.mrf.mxu1 }
 0x527   : > { %2097 = vmatpush3.msra.mxu0 %v624_v28 }
 0x528   : > { %2099 = vmatmul.mubr.msk.f32.vlgmr.msra.gmra.mxu0 %vm183_vm1, %v546_v24  ;;  %2106 = vmatprep.subr.mxu0 %v2204_v0 }
 0x529   : > { %2108 = vmatprep.mubr.msk.f32.mxu0 %vm2205_vm0, %v2204_v0 }
 0x5e8   : > { %v691_v30 = vpop.f32.mrf.mxu0 }
 0x5e9   : > { %v695_v31 = vsub.f32 %v2269_v17, %v691_v30 }
 0x5ea   : > { %v2100_v32 = vpop.f32.mrf.mxu0 }
 0x5eb   : > { %2102 = vmatpush3.msra.mxu1 %v695_v31 }
 0x5ec   : > { %2104 = vmatmul.mubr.msk.f32.vlgmr.msra.gmra.mxu1 %vm183_vm1, %v479_v22  ;;  %2111 = vmatprep.subr.mxu1 %v2204_v0 }
 0x5ed   : > { %2113 = vmatprep.mubr.msk.f32.mxu1 %vm2205_vm0, %v2204_v0 }
 0x6ac   : > { %v765_v33 = vpop.f32.mrf.mxu1 }
 0x6ad   : > { %v769_v34 = vmul.f32 0.25, %v765_v33 }
 0x6ae   : > { %v2105_v35 = vpop.f32.mrf.mxu1 }
 0x6af   : > { %2107 = vmatpush3.msra.mxu0 %v769_v34 }
 0x6b0   : > { %2109 = vmatmul.mubr.msk.f32.vlgmr.msra.gmra.mxu0 %vm183_vm1, %v2242_v1  ;;  %2116 = vmatprep.subr.mxu0 %v2204_v0 }
 0x6b1   : > { %2118 = vmatprep.mubr.msk.f32.mxu0 %vm2205_vm0, %v2204_v0 }
 0x770   : > { %v836_v36 = vpop.f32.mrf.mxu0 }
 0x771   : > { %v840_v37 = vsub.f32 %v2255_v9, %v836_v36 }
 0x772   : > { %v2110_v38 = vpop.f32.mrf.mxu0 }
 0x773   : > { %2112 = vmatpush3.msra.mxu1 %v840_v37 }
 0x774   : > { %2114 = vmatmul.mubr.msk.f32.vlgmr.msra.gmra.mxu1 %vm183_vm1, %v836_v36  ;;  %2121 = vmatprep.subr.mxu1 %v2204_v0 }
 0x775   : > { %2123 = vmatprep.mubr.msk.f32.mxu1 %vm2205_vm0, %v2204_v0 }
 0x834   : > { %v910_v39 = vpop.f32.mrf.mxu1 }
 0x835   : > { %v914_v40 = vsub.f32 %v2262_v13, %v910_v39 }
 0x836   : > { %v2115_v41 = vpop.f32.mrf.mxu1 }
 0x837   : > { %2117 = vmatpush3.msra.mxu0 %v914_v40 }
 0x838   : > { %2119 = vmatmul.mubr.msk.f32.vlgmr.msra.gmra.mxu0 %vm183_vm1, %v836_v36  ;;  %2126 = vmatprep.subr.mxu0 %v2204_v0 }
 0x839   : > { %2128 = vmatprep.mubr.msk.f32.mxu0 %vm2205_vm0, %v2204_v0 }
 0x8f8   : > { %v981_v42 = vpop.f32.mrf.mxu0 }
 0x8f9   : > { %v985_v43 = vsub.f32 %v2269_v17, %v981_v42 }
 0x8fa   : > { %v2120_v44 = vpop.f32.mrf.mxu0 }
 0x8fb   : > { %2122 = vmatpush3.msra.mxu1 %v985_v43 }
 0x8fc   : > { %2124 = vmatmul.mubr.msk.f32.vlgmr.msra.gmra.mxu1 %vm183_vm1, %v769_v34  ;;  %2131 = vmatprep.subr.mxu1 %v2204_v0 }
 0x8fd   : > { %2133 = vmatprep.mubr.msk.f32.mxu1 %vm2205_vm0, %v2204_v0 }
 0x9bc   : > { %v1055_v45 = vpop.f32.mrf.mxu1 }
 0x9bd   : > { %v1059_v46 = vmul.f32 0.25, %v1055_v45 }
 0x9be   : > { %v2125_v47 = vpop.f32.mrf.mxu1 }
 0x9bf   : > { %2127 = vmatpush3.msra.mxu0 %v1059_v46 }
 0x9c0   : > { %2129 = vmatmul.mubr.msk.f32.vlgmr.msra.gmra.mxu0 %vm183_vm1, %v2242_v1  ;;  %2136 = vmatprep.subr.mxu0 %v2204_v0 }
 0x9c1   : > { %2138 = vmatprep.mubr.msk.f32.mxu0 %vm2205_vm0, %v2204_v0 }
 0xa80   : > { %v1126_v48 = vpop.f32.mrf.mxu0 }
 0xa81   : > { %v1130_v49 = vsub.f32 %v2255_v9, %v1126_v48 }
 0xa82   : > { %v2130_v50 = vpop.f32.mrf.mxu0 }
 0xa83   : > { %2132 = vmatpush3.msra.mxu1 %v1130_v49 }
 0xa84   : > { %2134 = vmatmul.mubr.msk.f32.vlgmr.msra.gmra.mxu1 %vm183_vm1, %v1126_v48  ;;  %2141 = vmatprep.subr.mxu1 %v2204_v0 }
 0xa85   : > { %2143 = vmatprep.mubr.msk.f32.mxu1 %vm2205_vm0, %v2204_v0 }
 0xb44   : > { %v1200_v51 = vpop.f32.mrf.mxu1 }
 0xb45   : > { %v1204_v52 = vsub.f32 %v2262_v13, %v1200_v51 }
 0xb46   : > { %v2135_v53 = vpop.f32.mrf.mxu1 }
 0xb47   : > { %2137 = vmatpush3.msra.mxu0 %v1204_v52 }
 0xb48   : > { %2139 = vmatmul.mubr.msk.f32.vlgmr.msra.gmra.mxu0 %vm183_vm1, %v1126_v48  ;;  %2146 = vmatprep.subr.mxu0 %v2204_v0 }
 0xb49   : > { %2148 = vmatprep.mubr.msk.f32.mxu0 %vm2205_vm0, %v2204_v0 }
 0xc08   : > { %v1271_v54 = vpop.f32.mrf.mxu0 }
 0xc09   : > { %v1275_v55 = vsub.f32 %v2269_v17, %v1271_v54 }
 0xc0a   : > { %v2140_v56 = vpop.f32.mrf.mxu0 }
 0xc0b   : > { %2142 = vmatpush3.msra.mxu1 %v1275_v55 }
 0xc0c   : > { %2144 = vmatmul.mubr.msk.f32.vlgmr.msra.gmra.mxu1 %vm183_vm1, %v1059_v46  ;;  %2151 = vmatprep.subr.mxu1 %v2204_v0 }
 0xc0d   : > { %2153 = vmatprep.mubr.msk.f32.mxu1 %vm2205_vm0, %v2204_v0 }
 0xccc   : > { %v1345_v57 = vpop.f32.mrf.mxu1 }
 0xccd   : > { %v1349_v58 = vmul.f32 0.25, %v1345_v57 }
 0xcce   : > { %v2145_v59 = vpop.f32.mrf.mxu1 }
 0xccf   : > { %2147 = vmatpush3.msra.mxu0 %v1349_v58 }
 0xcd0   : > { %2149 = vmatmul.mubr.msk.f32.vlgmr.msra.gmra.mxu0 %vm183_vm1, %v2242_v1  ;;  %2156 = vmatprep.subr.mxu0 %v2204_v0 }
 0xcd1   : > { %2158 = vmatprep.mubr.msk.f32.mxu0 %vm2205_vm0, %v2204_v0 }
 0xd90   : > { %v1416_v60 = vpop.f32.mrf.mxu0 }
 0xd91   : > { %v1420_v61 = vsub.f32 %v2255_v9, %v1416_v60 }
 0xd92   : > { %v2150_v62 = vpop.f32.mrf.mxu0 }
 0xd93   : > { %2152 = vmatpush3.msra.mxu1 %v1420_v61 }
 0xd94   : > { %2154 = vmatmul.mubr.msk.f32.vlgmr.msra.gmra.mxu1 %vm183_vm1, %v1416_v60  ;;  %2161 = vmatprep.subr.mxu1 %v2204_v0 }
 0xd95   : > { %2163 = vmatprep.mubr.msk.f32.mxu1 %vm2205_vm0, %v2204_v0 }
 0xe54   : > { %v1490_v63 = vpop.f32.mrf.mxu1 }
 0xe55   : > { %v1494_v2 = vsub.f32 %v2262_v13, %v1490_v63 }
 0xe56   : > { %v2155_v3 = vpop.f32.mrf.mxu1 }
 0xe57   : > { %2157 = vmatpush3.msra.mxu0 %v1494_v2 }
 0xe58   : > { %2159 = vmatmul.mubr.msk.f32.vlgmr.msra.gmra.mxu0 %vm183_vm1, %v1416_v60  ;;  %2166 = vmatprep.subr.mxu0 %v2204_v0 }
 0xe59   : > { %2168 = vmatprep.mubr.msk.f32.mxu0 %vm2205_vm0, %v2204_v0 }
 0xf18   : > { %v1561_v4 = vpop.f32.mrf.mxu0 }
 0xf19   : > { %v1565_v5 = vsub.f32 %v2269_v17, %v1561_v4 }
 0xf1a   : > { %v2160_v6 = vpop.f32.mrf.mxu0 }
 0xf1b   : > { %2162 = vmatpush3.msra.mxu1 %v1565_v5 }
 0xf1c   : > { %2164 = vmatmul.mubr.msk.f32.vlgmr.msra.gmra.mxu1 %vm183_vm1, %v1349_v58  ;;  %2171 = vmatprep.subr.mxu1 %v2204_v0 }
 0xf1d   : > { %2173 = vmatprep.mubr.msk.f32.mxu1 %vm2205_vm0, %v2204_v0 }
 0xfdc   : > { %v1635_v7 = vpop.f32.mrf.mxu1 }
 0xfdd   : > { %v1639_v8 = vmul.f32 0.25, %v1635_v7 }
 0xfde   : > { %v2165_v10 = vpop.f32.mrf.mxu1 }
 0xfdf   : > { %2167 = vmatpush3.msra.mxu0 %v1639_v8 }
 0xfe0   : > { %2169 = vmatmul.mubr.msk.f32.vlgmr.msra.gmra.mxu0 %vm183_vm1, %v2242_v1  ;;  %2176 = vmatprep.subr.mxu0 %v2204_v0 }
 0xfe1   : > { %2178 = vmatprep.mubr.msk.f32.mxu0 %vm2205_vm0, %v2204_v0 }
0x10a0   : > { %v1706_v11 = vpop.f32.mrf.mxu0 }
0x10a1   : > { %v1710_v12 = vsub.f32 %v2255_v9, %v1706_v11 }
0x10a2   : > { %v2170_v14 = vpop.f32.mrf.mxu0 }
0x10a3   : > { %2172 = vmatpush3.msra.mxu1 %v1710_v12 }
0x10a4   : > { %2174 = vmatmul.mubr.msk.f32.vlgmr.msra.gmra.mxu1 %vm183_vm1, %v1706_v11  ;;  %2181 = vmatprep.subr.mxu1 %v2204_v0 }
0x10a5   : > { %2183 = vmatprep.mubr.msk.f32.mxu1 %vm2205_vm0, %v2204_v0 }
0x1164   : > { %v1780_v15 = vpop.f32.mrf.mxu1 }
0x1165   : > { %v1784_v1 = vsub.f32 %v2262_v13, %v1780_v15 }
0x1166   : > { %v2175_v16 = vpop.f32.mrf.mxu1 }
0x1167   : > { %2177 = vmatpush3.msra.mxu0 %v1784_v1 }
0x1168   : > { %2179 = vmatmul.mubr.msk.f32.vlgmr.msra.gmra.mxu0 %vm183_vm1, %v1706_v11 }
0x1228   : > { %v1851_v18 = vpop.f32.mrf.mxu0 }
0x1229   : > { %v1855_v9 = vsub.f32 %v2269_v17, %v1851_v18 }
0x122a   : > { %v2180_v19 = vpop.f32.mrf.mxu0 }
0x122b   : > { %2182 = vmatpush3.msra.mxu1 %v1855_v9 }
0x122c   : > { %2184 = vmatmul.mubr.msk.f32.vlgmr.msra.gmra.mxu1 %vm183_vm1, %v1639_v8 }
0x12ec   : > { %v1925_v0 = vpop.f32.mrf.mxu1 }
0x12ed   : > { %v1929_v20 = vmul.f32 0.25, %v1925_v0 }
0x12ee   : > { %v2185_v21 = vpop.f32.mrf.mxu1 }
0x12ef   : > { %1930 = vst.msk [vmem:[%s139_s19] sm:$0xff] %vm183_vm1, %v1929_v20 }
0x12f0 PF: > { %s13_s11 = sadd.s32 1, %s2202_s11  }
0x12f1   : > { %p10_p4 = scmp.ge.s32.totalorder %s13_s11, 6  }
0x12f3   :  { %12 = sbr.rel (!%p10_p4) target bundleno = 2 (0x2), region = 58 }

// kernel: nystrom_attention_forward.10
= control target key start
LH: loop header
LB: loop body
LE: loop exit
PB: predicated region body
PF: predicated region fallthrough
CT: control target
= control target key end

     0   :  { %10 = vsyncpa [#allocation3], 0  ;;  %s783_s18 = smov 0   ;;  %s785_s19 = smov 0   ;;  %s882_s0 = inlined_call_operand.vmem [shape: f32[4], index: 0, kind: input, shape index: {}]   ;;  %s883_s1 = inlined_call_operand.vmem [shape: f32[4,8,64], index: 1, kind: input, shape index: {}]   ;;  %s884_s2 = inlined_call_operand.vmem [shape: f32[4,8,64], index: 2, kind: input, shape index: {}]   ;;  %s885_s3 = inlined_call_operand.vmem [shape: bf16[4,16,64], index: 3, kind: input, shape index: {}]   ;;  %s886_s4 = inlined_call_operand.vmem [shape: bf16[4,16,64], index: 4, kind: input, shape index: {}]   ;;  %s887_s5 = inlined_call_operand.vmem [shape: bf16[4,16,64], index: 5, kind: output, shape index: {}]  }
   0x1   :  { %s787_s20 = smov 0   ;;  %s789_s21 = smov 0  }
   0x2   :  { %s791_s22 = smov 0  }
   0x3 LB: > { %s599_s23 = sadd.s32 4294967295, %s748_s22   ;;  %s25_s24 = sadd.s32 1, %s740_s20  ;;  %s748_s22 = sphi %s791_s22, %s16_s22   ;;  %s744_s21 = sphi %s789_s21, %s893_s21   ;;  %s740_s20 = sphi %s787_s20, %s892_s20   ;;  %s736_s19 = sphi %s785_s19, %s891_s19   ;;  %s732_s18 = sphi %s783_s18, %s890_s18  }
   0x4   : > { %p26_p0 = scmp.ge.s32.totalorder %s25_s24, 2  ;;  %s28_s25 = sadd.s32 1, %s744_s21 }
   0x5   : > { %p601_p1 = scmp.ge.s32.totalorder %s748_s22, 1  ;;  %p190_p2 = scmp.lt.s32.totalorder %s748_s22, 9 }
   0x6   : > { %s895_s24 = smov (%p26_p0, %s25_s24), 0  ;;  %s897_s25 = smov (!%p26_p0, %s28_s25), %s744_s21 }
   0x7   : > { %p816_p3 = pnand %p601_p1, %p190_p2  ;;  %p30_p4 = scmp.ge.s32.totalorder %s897_s25, 4 }
   0x8   : > { %p820_p5 = scmp.eq.s32.totalorder %s599_s23, 0  ;;  %s203_s30 = sshll.u32 %s882_s0, 4  ;;  %s204_s30 = int_to_ptr.vmem [resolvable:$true] %s203_s30 }
   0x9   : > { %p638_p6 = pneg %p816_p3  ;;  %s899_s25 = smov (%p30_p4, %s897_s25), 0 }
   0xa   : > { %s691_s6 = scalar_lea.vmem %s204_s30, 16  ;;  %p699_p12 = scmp.lt.s32.totalorder %s204_s30, %s204_s30 }
   0xb   : > { %p639_p7 = pnand %p820_p5, %p638_p6  ;;  %p692_p8 = scmp.ne.s32.totalorder %s204_s30, %s691_s6 }
   0xc   : > { %p700_p13 = scmp.lt.s32.totalorder %s691_s6, %s691_s6 }
   0xd   : > { %p693_p9 = pneg %p639_p7 }
   0xe   : > { %p701_p0 = por %p700_p13, %p699_p12 }
   0xf   : > { %p694_p10 = pnand %p693_p9, %p692_p8 }
  0x11   : > { %p695_p11 = pneg %p694_p10 }
  0x13   : > { %p702_p1 = pnand %p701_p0, %p695_p11 }
  0x15   : > { %705 = shalt.err (!%p702_p1)
}
  0x16   : > { %s750_s7 = smov [#allocation2]   ;;  %252 = sbr.rel (%p816_p3) target bundleno = 601 (0x259), region = 40 }
  0x17   : > { %641 = dma.vmem_to_smem (!%p639_p7), %s204_s30, 16, %s750_s7, [#allocation3]  }
  0x1b   : > { %727 = dma.done.wait (%p820_p5), [#allocation3], 16  }
  0x1c   : > { %729 = vsyncadd (%p820_p5), [#allocation3], 4294967280 }
  0x1d   : > { %258 = sfence }
  0x1e   : > { %p303_p2 = scmp.lt.s32.totalorder %s736_s19, 3  ;;  %p313_p4 = scmp.lt.s32.totalorder %s732_s18, 1  ;;  %v751_v0 = vmov 0.0   ;;  %vm752_vm0 = vmmov 0   ;;  %vm340_vm1 = vcmask 523264   ;;  %vm387_vm2 = vcmask 64512  }
  0x1f   : > { %622 = vmatprep.subr.bf16.mxu0 %v751_v0  ;;  %624 = vmatprep.mubr.msk.bf16.mxu0 %vm752_vm0, %v751_v0  ;;  %vm403_vm3 = vcmask 1043456   ;;  %s451_s28 = sld [smem:[#allocation2 + %s736_s19]]  ;;  %vm456_vm4 = vcmask 519168  }
  0x20   : > { %s304_s8 = scalar_select %p303_p2, %s736_s19, 3  ;;  %628 = vmatprep.subr.bf16.mxu1 %v751_v0  ;;  %630 = vmatprep.mubr.msk.bf16.mxu1 %vm752_vm0, %v751_v0 }
  0x21   : > { %s901_s18 = smov (!%p313_p4, %s732_s18), 1 }
  0x22   : > { %s606_s9 = sshll.u32 %s304_s8, 3  ;;  %s608_s10 = sshll.u32 %s304_s8, 1 }
  0x23   : > { %s306_s13 = scalar_lea.vmem %s883_s1, %s606_s9  ;;  %s316_s14 = sadd.s32 %s608_s10, %s901_s18 }
  0x24   : > { %v336_v1 = vld [vmem:[%s306_s13] sm:$0xff]  ;;  %s846_s15 = sshll.u32 %s316_s14, 2  ;;  %s310_s27 = scalar_lea.vmem %s884_s2, %s606_s9 }
  0x25   : > { %v337_v2 = vmul.f32 0.125, %v336_v1  ;;  %s318_s23 = scalar_lea.vmem %s885_s3, %s846_s15  ;;  %v398_v11 = vld [vmem:[%s310_s27] sm:$0xff]  ;;  %s326_s6 = scalar_lea.vmem %s886_s4, %s846_s15  ;;  %v452_v23 = vstv %s451_s28 }
  0x26   : > { %v339_v5 = vld [vmem:[%s318_s23] sm:$0xf]  ;;  %v399_v12 = vpack.c.bf16 %v398_v11, %v398_v11  ;;  %s334_s9 = scalar_lea.vmem %s887_s5, %s846_s15 }
  0x27   : > { %v338_v3 = vpack.c.bf16 %v337_v2, %v337_v2  ;;  %v449_v21 = vld [vmem:[%s326_s6] sm:$0xf] }
  0x28   : > { %v405_v13 = vsel %vm403_vm3, %v399_v12, 0  ;;  %v450_v22 = vunpack.c.l.bf16 %v449_v21 }
  0x29   : > { %v345_v4 = vsel %vm340_vm1, %v338_v3, 0  ;;  %629 = vmatpush3.bf16.msra.mxu1 %v405_v13 }
  0x2a   : > { %623 = vmatpush3.bf16.xpose.msra.mxu0 %v345_v4  ;;  %v453_v24 = vmul.f32 %v452_v23, %v450_v22 }
  0x31   : > { %625 = vmatmul.mubr.msk.bf16.vlgmr.msra.gmra.mxu0 %vm340_vm1, %v339_v5 }
  0xf1   : > { %v381_v6 = vpop.f32.mrf.mxu0 }
  0xf2   : > { %v388_v7 = vsel %vm387_vm2, %v381_v6, -inf }
  0xf3   : > { %389 = vmax.xlane.f32.xlu0 %v388_v7  ;;  %v626_v8 = vpop.f32.mrf.mxu0 }
  0xf5   : > { %v384_v9 = vpop.f32.mrf.mxu0 }
  0xf7   : > { %v627_v10 = vpop.f32.mrf.mxu0 }
 0x17c   : > { %v390_v14 = vpop.xlane.xlu0 %389 }
 0x17d   : > { %v391_v15 = vsub.f32 %v381_v6, %v390_v14 }
 0x17f   : > { %v392_v16 = vmul.f32 1.442695, %v391_v15 }
 0x181   : > { %687 = vpow2.f32 %v392_v16 }
 0x18e   : > { %v688_v17 = vpop.eup %687 }
 0x18f   : > { %v394_v18 = vsel %vm387_vm2, %v688_v17, 0.0  ;;  %v397_v19 = vpack.c.bf16 %v688_v17, %v688_v17 }
 0x190   : > { %395 = vadd.xlane.f32.xlu0 %v394_v18 }
 0x191   : > { %631 = vmatmul.mubr.msk.bf16.vlgmr.msra.gmra.mxu1 %vm387_vm2, %v397_v19 }
 0x219   : > { %v396_v20 = vpop.xlane.xlu0 %395 }
 0x21a   : > { %689 = vrcp.f32 %v396_v20 }
 0x227   : > { %v690_v25 = vpop.eup %689 }
 0x251   : > { %v441_v26 = vpop.f32.mrf.mxu1 }
 0x252   : > { %v448_v27 = vmul.f32 %v690_v25, %v441_v26 }
 0x253   : > { %v632_v28 = vpop.f32.mrf.mxu1 }
 0x254   : > { %v454_v29 = vadd.f32 %v453_v24, %v448_v27 }
 0x255   : > { %v444_v30 = vpop.f32.mrf.mxu1 }
 0x256   : > { %v455_v31 = vpack.c.bf16 %v454_v29, %v454_v29 }
 0x257   : > { %v633_v32 = vpop.f32.mrf.mxu1 }
 0x258   : > { %457 = vst.msk [vmem:[%s334_s9] sm:$0xf] %vm456_vm4, %v455_v31 }
 0x259 PF: > { %s16_s22 = sadd.s32 1, %s748_s22   ;;  %s890_s18 = smov %s740_s20 }
 0x25a   : > { %p13_p3 = scmp.ge.s32.totalorder %s16_s22, 10   ;;  %s891_s19 = smov %s744_s21 }
 0x25b   : > { %s892_s20 = smov %s895_s24  ;;  %s893_s21 = smov %s899_s25 }
 0x25c   :  { %15 = sbr.rel (!%p13_p3) target bundleno = 3 (0x3), region = 84 }
 0x261   :  { %485 = vsyncpa [#allocation3], 1 }
 0x262   :  { %487 = vsyncpa [#allocation3 + $0x1], 1 }

// kernel: nystrom_attention_forward.11
= control target key start
LH: loop header
LB: loop body
LE: loop exit
PB: predicated region body
PF: predicated region fallthrough
CT: control target
= control target key end

     0   :  { %s560_s12 = smov 0   ;;  %s562_s13 = smov 0   ;;  %s670_s0 = inlined_call_operand.vmem [shape: bf16[2,32,64], index: 0, kind: input, shape index: {}]   ;;  %s671_s1 = inlined_call_operand.vmem [shape: f32[2,64,64], index: 1, kind: input, shape index: {}]   ;;  %s672_s2 = inlined_call_operand.vmem [shape: f32[1,64], index: 2, kind: input, shape index: {}]   ;;  %s673_s3 = inlined_call_operand.vmem [shape: f32[32,64], index: 3, kind: output, shape index: {}]  }
   0x1   :  { %s564_s14 = smov 0  }
   0x2 LB: > { %s431_s15 = sadd.s32 4294967295, %s536_s14   ;;  %s577_s16 = sadd.s32 1, %s536_s14   ;;  %s536_s14 = sphi %s564_s14, %s676_s14   ;;  %s532_s13 = sphi %s562_s13, %s675_s13   ;;  %s528_s12 = sphi %s560_s12, %s674_s12  }
   0x3   : > { %s17_s17 = ssub.s32 %s536_s14, %s577_s16  ;;  %s20_s18 = sadd.s32 1, %s532_s13 }
   0x4   : > { %p18_p0 = scmp.eq.s32.totalorder %s17_s17, 0  ;;  %p27_p1 = scmp.ne.s32.totalorder %s532_s13, %s528_s12 }
   0x5   : > { %p28_p2 = scmp.eq.s32.totalorder %s536_s14, 0  ;;  %p434_p4 = scmp.ge.s32.totalorder %s536_s14, 2 }
   0x6   : > { %s586_s19 = scalar_select %p18_p0, %s532_s13, %s20_s18  }
   0x7   : > { %p29_p3 = por %p28_p2, %p27_p1  ;;  %127 = sbr.rel (%p434_p4) target bundleno = 17 (0x11), region = 24 }
   0xc   : > { %130 = sbr.rel (!%p29_p3) target bundleno = 17 (0x11), region = 28  ;;  %s132_s20 = sand.u32 (%p29_p3), 1, %s532_s13  }
   0xd   : > { %s451_s21 = sshll.u32 (%p29_p3), %s536_s14, 3  ;;  %s435_s22 = sshll.u32 (%p29_p3), %s132_s20, 4 }
   0xe   : > { %s137_s25 = scalar_lea.vmem (%p29_p3), %s670_s0, %s451_s21  ;;  %s134_s26 = scalar_lea.vmem (%p29_p3), [#allocation2], %s435_s22 }
   0xf   : > { %v154_v0 = vld [vmem:[%s137_s25] sm:$0xff] (%p29_p3)   ;;  %v158_v1 = vld [vmem:[%s137_s25 + $0x10] sm:$0xff] (%p29_p3)  }
  0x10   : > { %155 = vst [vmem:[%s134_s26] sm:$0xff] (%p29_p3), %v154_v0   ;;  %159 = vst [vmem:[%s134_s26 + $0x8] sm:$0xff] (%p29_p3), %v158_v1  }
  0x11 PF: > { %p438_p5 = scmp.ge.s32.totalorder %s536_s14, 1  ;;  %p192_p6 = scmp.lt.s32.totalorder %s536_s14, 3 }
  0x13   : > { %p193_p7 = pnand %p438_p5, %p192_p6 }
  0x14   : > { %s199_s6 = sand.u32 (!%p193_p7), 1, %s528_s12  }
  0x15   : > { %196 = sbr.rel (%p193_p7) target bundleno = 247 (0xf7), region = 69  ;;  %s615_s18 = sshll.u32 (!%p193_p7), %s199_s6, 4 }
  0x16   : > { %s201_s4 = scalar_lea.vmem (!%p193_p7), [#allocation2], %s615_s18  ;;  %s440_s18 = sshll.u32 (!%p193_p7), %s431_s15, 1 }
  0x17   : > { %p224_p8 = scmp.lt.s32.totalorder (!%p193_p7), %s440_s18, 3 }
  0x1a   : > { %v244_v2 = vld [vmem:[%s671_s1 + $0x70] sm:$0xff]  ;;  %v245_v3 = vld [vmem:[%s671_s1 + $0x78] sm:$0xff]  ;;  %v538_v5 = vmov 0.0   ;;  %v242_v8 = vld [vmem:[%s671_s1 + $0x60] sm:$0xff]  ;;  %vm539_vm0 = vmmov 0   ;;  %vm264_vm1 = vcmask 523264  }
  0x1b   : > { %v236_v4 = vld [vmem:[%s671_s1 + $0x30] sm:$0xff]  ;;  %462 = vmatprep.subr.bf16.mxu0 %v538_v5  ;;  %474 = vmatprep.subr.bf16.mxu1 %v538_v5  ;;  %v253_v6 = vpack.c.bf16 %v245_v3, %v244_v2  ;;  %v237_v7 = vld [vmem:[%s671_s1 + $0x38] sm:$0xff]  ;;  %v243_v9 = vld [vmem:[%s671_s1 + $0x68] sm:$0xff]  ;;  %s678_s18 = smov (!%p224_p8, %s440_s18), 3 }
  0x1c   : > { %v249_v10 = vpack.c.bf16 %v237_v7, %v236_v4  ;;  %v234_v11 = vld [vmem:[%s671_s1 + $0x20] sm:$0xff]  ;;  %v235_v12 = vld [vmem:[%s671_s1 + $0x28] sm:$0xff]  ;;  %470 = vmatprep.mubr.msk.bf16.mxu0 %vm539_vm0, %v538_v5  ;;  %482 = vmatprep.mubr.msk.bf16.mxu1 %vm539_vm0, %v538_v5  ;;  %v252_v13 = vpack.c.bf16 %v243_v9, %v242_v8  ;;  %v240_v15 = vld [vmem:[%s671_s1 + $0x50] sm:$0xff]  ;;  %s441_s12 = sshll.u32 %s678_s18, 3 }
  0x1d   : > { %463 = vmatpush3.bf16.msra.mxu0 %v253_v6  ;;  %v248_v14 = vpack.c.bf16 %v235_v12, %v234_v11  ;;  %v241_v16 = vld [vmem:[%s671_s1 + $0x58] sm:$0xff]  ;;  %v232_v17 = vld [vmem:[%s671_s1 + $0x10] sm:$0xff]  ;;  %v238_v21 = vld [vmem:[%s671_s1 + $0x40] sm:$0xff]  ;;  %s227_s24 = scalar_lea.vmem %s673_s3, %s441_s12 }
  0x1e   : > { %475 = vmatpush3.bf16.msra.mxu1 %v249_v10  ;;  %464 = vmatprep.subr.bf16.mxu0 %v538_v5  ;;  %v233_v18 = vld [vmem:[%s671_s1 + $0x18] sm:$0xff]  ;;  %v251_v19 = vpack.c.bf16 %v241_v16, %v240_v15  ;;  %v239_v22 = vld [vmem:[%s671_s1 + $0x48] sm:$0xff]  ;;  %v230_v23 = vld [vmem:[%s671_s1] sm:$0xff] }
  0x1f   : > { %476 = vmatprep.subr.bf16.mxu1 %v538_v5  ;;  %v247_v20 = vpack.c.bf16 %v233_v18, %v232_v17  ;;  %v231_v24 = vld [vmem:[%s671_s1 + $0x8] sm:$0xff]  ;;  %v250_v25 = vpack.c.bf16 %v239_v22, %v238_v21  ;;  %v513_v28 = vld [vmem:[%s201_s4] sm:$0xff]  }
  0x20   : > { %v246_v26 = vpack.c.bf16 %v231_v24, %v230_v23  ;;  %v512_v27 = vld [vmem:[%s201_s4 + $0x8] sm:$0xff]   ;;  %v448_v31 = vld [vmem:[%s672_s2] ss:$0 sm:$0xff] }
  0x21   : > { %465 = vmatpush3.bf16.msra.mxu0 %v252_v13 }
  0x22   : > { %477 = vmatpush3.bf16.msra.mxu1 %v248_v14  ;;  %466 = vmatprep.subr.bf16.mxu0 %v538_v5 }
  0x23   : > { %478 = vmatprep.subr.bf16.mxu1 %v538_v5 }
  0x25   : > { %467 = vmatpush3.bf16.msra.mxu0 %v251_v19 }
  0x26   : > { %479 = vmatpush3.bf16.msra.mxu1 %v247_v20  ;;  %468 = vmatprep.subr.bf16.mxu0 %v538_v5 }
  0x27   : > { %480 = vmatprep.subr.bf16.mxu1 %v538_v5 }
  0x29   : > { %469 = vmatpush3.bf16.msra.mxu0 %v250_v25 }
  0x2a   : > { %481 = vmatpush3.bf16.msra.mxu1 %v246_v26 }
  0x2c   : > { %471 = vmatmul.mubr.msk.bf16.vlgmr.msra.gmra.mxu0 %vm264_vm1, %v512_v27 }
  0x2d   : > { %483 = vmatmul.mubr.msk.bf16.vlgmr.msra.gmra.mxu1 %vm264_vm1, %v513_v28 }
  0xec   : > { %v302_v29 = vpop.f32.mrf.mxu0 }
  0xed   : > { %v351_v30 = vpop.f32.mrf.mxu1 }
  0xee   : > { %v352_v32 = vadd.f32 %v351_v30, %v302_v29  ;;  %v472_v33 = vpop.f32.mrf.mxu0 }
  0xef   : > { %v484_v34 = vpop.f32.mrf.mxu1 }
  0xf0   : > { %v365_v35 = vadd.f32 %v448_v31, %v352_v32  ;;  %v305_v36 = vpop.f32.mrf.mxu0 }
  0xf1   : > { %v354_v37 = vpop.f32.mrf.mxu1 }
  0xf2   : > { %367 = vst.msk [vmem:[%s227_s24] sm:$0xff] %vm264_vm1, %v365_v35  ;;  %v355_v38 = vadd.f32 %v354_v37, %v305_v36  ;;  %v473_v39 = vpop.f32.mrf.mxu0 }
  0xf3   : > { %v485_v40 = vpop.f32.mrf.mxu1 }
  0xf4   : > { %v366_v41 = vadd.f32 %v448_v31, %v355_v38 }
  0xf6   : > { %368 = vst.msk [vmem:[%s227_s24 + $0x8] sm:$0xff] %vm264_vm1, %v366_v41 }
  0xf7 PF: > { %p10_p9 = scmp.ge.s32.totalorder %s577_s16, 4   ;;  %s674_s12 = smov %s532_s13 }
  0xf8   : > { %s675_s13 = smov %s586_s19  ;;  %s676_s14 = smov %s577_s16 }
  0xf9   :  { %12 = sbr.rel (!%p10_p9) target bundleno = 2 (0x2), region = 109 }

</bundles_post_ra>
